<compile_context>
chip_gen: v5e
topology: v5e:2x2
jax: 0.10.0
libtpu: 0.0.40
codegen_flags: <defaults>
</compile_context>

<pallas_src>
import functools

import jax
import jax.numpy as jnp
from jax import lax
from jax.experimental import pallas as pl
from jax.experimental.pallas import tpu as pltpu

NGF = 4
CIN = 8 * NGF        # 32
C1 = 100             # conv1 output channels (logical)
C1P = 128            # conv1 channels padded to a full lane width
K9 = 9 * CIN         # 288 = im2col contraction depth
BN_EPS = 1e-5
BIAS_CH = C1P - 1    # spare padded channel that carries the conv2 bias


def _round_up(x, m):
    return ((x + m - 1) // m) * m


def _pick_tiles(m, desired1, desired2):
    """Row-tile sizes for the two passes.

    Multiples of 128, capped by the requested sizes, clamped so that each pass
    keeps >= 2 grid steps when M allows (v7x megacore), and chosen so that both
    tile sizes divide the common padded row count.
    """
    b1 = min(desired1, max(128, _round_up(-(-m // 2), 128)))
    m_pad = _round_up(m, b1)
    n1 = m_pad // b1
    k = 1
    for cand in (8, 4, 2):                  # b2 = k*b1 must divide m_pad
        if b1 * cand <= desired2 and n1 % cand == 0 and n1 // cand >= 2:
            k = cand
            break
    return b1, b1 * k, m_pad, n1, n1 // k


# ---------------------------------------------------------------------------
# Pass 1: 3x3 conv as one im2col matmul (bf16 in, f32 acc) + BN partial stats.
# ---------------------------------------------------------------------------
def _conv_stats_kernel(p_ref, w1_ref, z_ref, stats_ref):
    """p:(TM,288)bf16  w1:(288,128)bf16  z:(TM,128)bf16  stats:(8,128)f32."""
    z = jnp.dot(p_ref[...], w1_ref[...], preferred_element_type=jnp.float32)
    # Per-tile partial sums for train-mode BatchNorm, taken from the f32
    # accumulator *before* the bf16 down-cast; combined in the wrapper so this
    # grid axis can stay "parallel" (megacore-friendly).  Single full (8,128)
    # store -> no masked row stores.
    sum_row = jnp.sum(z, axis=0, keepdims=True)
    sq_row = jnp.sum(z * z, axis=0, keepdims=True)
    stats_ref[...] = jnp.concatenate(
        [sum_row, sq_row, jnp.zeros((6, C1P), jnp.float32)], axis=0)
    z_ref[...] = z.astype(z_ref.dtype)


# ---------------------------------------------------------------------------
# Pass 2: folded BN (scale/shift) + ReLU + 1x1 conv + sigmoid, lane-dense out.
# ---------------------------------------------------------------------------
def _bn_act_kernel(z_ref, scale_ref, shift_ref, w2_ref, out_ref):
    """z:(TM,128)bf16  scale/shift:(1,128)f32  w2:(8,128)bf16  out:(1,TM)f32."""
    h = jnp.maximum(
        z_ref[...].astype(jnp.float32) * scale_ref[...] + shift_ref[...], 0.0)
    # 1x1 conv computed transposed so the result is already lane-dense:
    #   (8,128) @ (TM,128)^T -> (8,TM); only row 0 of w2 is real weight, and
    #   the conv2 bias rides on the constant h[:, BIAS_CH] == 1 channel.
    logits8 = lax.dot_general(
        w2_ref[...], h.astype(jnp.bfloat16),
        dimension_numbers=(((1,), (1,)), ((), ())),
        preferred_element_type=jnp.float32)
    logits = logits8[0:1, :]                               # (1, TM)
    # Sigmoid with the reciprocal on the EUP slot (exp also EUP).
    out_ref[...] = pl.reciprocal(1.0 + jnp.exp(-logits), approx=True)


# ---------------------------------------------------------------------------
# Wrapper
# ---------------------------------------------------------------------------
@functools.partial(jax.jit, static_argnames=("block_m1", "block_m2"))
def predictor_forward(x_nchw, params, *, block_m1=2048, block_m2=4096):
    """x_nchw: (B, 32, H, W) float32 -> (B, 1, H, W) float32."""
    w1, b1, gamma, beta, w2, b2 = params
    del b1  # cancelled exactly by the train-mode BN mean subtraction
    B, Cin, H, W = x_nchw.shape
    assert Cin == CIN

    M = B * H * W
    tm1, tm2, m_pad, n1, n2 = _pick_tiles(M, block_m1, block_m2)

    # ---- im2col in the wrapper (bf16): one K=288 matmul inside the kernel ---
    x_nhwc = jnp.transpose(x_nchw, (0, 2, 3, 1)).astype(jnp.bfloat16)
    x_p = jnp.pad(x_nhwc, ((0, 0), (1, 1), (1, 1), (0, 0)))
    patches = jnp.concatenate(
        [x_p[:, ky:ky + H, kx:kx + W, :] for ky in range(3) for kx in range(3)],
        axis=-1)                                        # (B, H, W, 288) bf16
    patches = patches.reshape(M, K9)
    patches = jnp.pad(patches, ((0, m_pad - M), (0, 0)))
    # Padded rows are all-zero -> z=0 there -> zero contribution to the BN
    # sums; their pass-2 outputs are sliced away at the end.

    # ---- parameter prep: pad channels 100 -> 128 (zeros stay exact), bf16 ---
    w1p = jnp.pad(w1.reshape(K9, C1),
                  ((0, 0), (0, C1P - C1))).astype(jnp.bfloat16)
    gamma_p = jnp.pad(gamma.reshape(C1), (0, C1P - C1))
    # Channel BIAS_CH is a pure bias lane: gamma=0 -> scale=0, beta=1 -> h==1,
    # and w2 carries b2 there, so no scalar bias operand reaches the kernels.
    beta_p = jnp.pad(beta.reshape(C1), (0, C1P - C1)).at[BIAS_CH].set(1.0)
    w2p = (jnp.zeros((8, C1P), jnp.float32)
           .at[0, :C1].set(w2[:, 0])
           .at[0, BIAS_CH].set(b2.reshape(()))).astype(jnp.bfloat16)

    # ---- pass 1: conv + partial BN stats, tiled & parallel over M ----------
    cost1 = pl.CostEstimate(
        flops=2 * m_pad * K9 * C1P,
        transcendentals=0,
        bytes_accessed=2 * m_pad * K9 + 2 * K9 * C1P + 2 * m_pad * C1P
                       + 4 * n1 * 8 * C1P)
    z, part = pl.pallas_call(
        _conv_stats_kernel,
        out_shape=(jax.ShapeDtypeStruct((m_pad, C1P), jnp.bfloat16),
                   jax.ShapeDtypeStruct((n1 * 8, C1P), jnp.float32)),
        grid=(n1,),
        in_specs=[pl.BlockSpec((tm1, K9), lambda i: (i, 0)),
                  pl.BlockSpec((K9, C1P), lambda i: (0, 0))],
        out_specs=(pl.BlockSpec((tm1, C1P), lambda i: (i, 0)),
                   pl.BlockSpec((8, C1P), lambda i: (i, 0))),
        compiler_params=pltpu.CompilerParams(
            dimension_semantics=("parallel",),
            vmem_limit_bytes=32 * 1024 * 1024),
        cost_estimate=cost1,
    )(patches, w1p)

    # ---- combine partial stats; fold BN into a single scale/shift FMA ------
    # NOTE: E[z^2]-E[z]^2 in f32 can lose precision for very large M; fine at
    # these sizes and guarded with max(var, 0).
    part = part.reshape(n1, 8, C1P)
    total = jnp.sum(part[:, 0, :], axis=0)                # sum z       (128,)
    total_sq = jnp.sum(part[:, 1, :], axis=0)             # sum z*z     (128,)
    mean = total / M                                      # true M (pad rows=0)
    var = jnp.maximum(total_sq / M - mean * mean, 0.0)    # biased, train mode
    scale = gamma_p * lax.rsqrt(var + BN_EPS)             # 0 on pad channels
    shift = beta_p - mean * scale                         # 1 on the bias lane

    # ---- pass 2: BN + ReLU + 1x1 conv + sigmoid, lane-dense (1, M) output --
    cost2 = pl.CostEstimate(
        flops=(2 * 8 + 4) * m_pad * C1P,
        transcendentals=2 * m_pad,
        bytes_accessed=2 * m_pad * C1P + 4 * m_pad + 12 * C1P)
    out_flat = pl.pallas_call(
        _bn_act_kernel,
        out_shape=jax.ShapeDtypeStruct((1, m_pad), jnp.float32),
        grid=(n2,),
        in_specs=[pl.BlockSpec((tm2, C1P), lambda i: (i, 0)),
                  pl.BlockSpec((1, C1P), lambda i: (0, 0)),
                  pl.BlockSpec((1, C1P), lambda i: (0, 0)),
                  pl.BlockSpec((8, C1P), lambda i: (0, 0))],
        out_specs=pl.BlockSpec((1, tm2), lambda i: (0, i)),
        compiler_params=pltpu.CompilerParams(
            dimension_semantics=("parallel",),
            vmem_limit_bytes=32 * 1024 * 1024),
        cost_estimate=cost2,
    )(z, scale.reshape(1, C1P), shift.reshape(1, C1P), w2p)

    # Lane-dense (1, m_pad) slab -> (B, 1, H, W)
    return out_flat[0, :M].reshape(B, H, W)[:, None, :, :]


# ---------------------------------------------------------------------------
# Parameters + pure-JAX reference (mirrors the PyTorch module in train mode)
# ---------------------------------------------------------------------------
def init_params(key):
    """Deterministic synthetic parameters, shapes per Predictor.__init__."""
    k1, k2, k3, k4 = jax.random.split(key, 4)
    # Conv2d(Cin, C1, 3): PyTorch weight (C1, Cin, 3, 3); we keep (3,3,Cin,C1).
    w1 = jax.random.normal(k1, (3, 3, CIN, C1), jnp.float32) * 0.05
    b1 = jax.random.normal(k2, (1, C1), jnp.float32) * 0.05
    # BatchNorm(100) defaults: weight=1, bias=0.
    gamma = jnp.ones((1, C1), jnp.float32)
    beta = jnp.zeros((1, C1), jnp.float32)
    # Conv2d(C1, 1, 1): PyTorch weight (1, C1, 1, 1); we keep (C1, 1).
    w2 = jax.random.normal(k3, (C1, 1), jnp.float32) * 0.05
    b2 = jax.random.normal(k4, (1, 1), jnp.float32) * 0.05
    return (w1, b1, gamma, beta, w2, b2)


def _reference_forward(x_nchw, params):
    """Pure-JAX f32 reference of the PyTorch forward (train-mode BN)."""
    w1, b1, gamma, beta, w2, b2 = params
    B, _, H, W = x_nchw.shape
    x_nhwc = jnp.transpose(x_nchw, (0, 2, 3, 1))
    xp = jnp.pad(x_nhwc, ((0, 0), (1, 1), (1, 1), (0, 0)))
    acc = jnp.zeros((B, H, W, C1), jnp.float32)
    for ky in range(3):
        for kx in range(3):
            acc = acc + jnp.einsum('bhwc,cd->bhwd',
                                   xp[:, ky:ky + H, kx:kx + W, :], w1[ky, kx])
    z = acc + b1.reshape(1, 1, 1, C1)
    mean = z.mean(axis=(0, 1, 2))
    var = ((z - mean) ** 2).mean(axis=(0, 1, 2))         # biased, train mode
    h = gamma.reshape(C1) * (z - mean) * lax.rsqrt(var + BN_EPS) + beta.reshape(C1)
    h = jnp.maximum(h, 0.0)
    logits = jnp.einsum('bhwc,co->bhwo', h, w2) + b2.reshape(1, 1, 1, 1)
    y = jax.nn.sigmoid(logits)
    return jnp.transpose(y, (0, 3, 1, 2))                 # (B,1,H,W)


if __name__ == "__main__":
    key = jax.random.PRNGKey(0)
    k_x, k_p = jax.random.split(key)

    B, H, W = 2, 16, 16
    x = jax.random.normal(k_x, (B, CIN, H, W), jnp.float32)  # NCHW like PyTorch
    params = init_params(k_p)

    # Default tile requests (2048 / 4096) get clamped to 256 here so that both
    # passes still run a 2-step "parallel" grid (exercises the multi-tile path).
    out = predictor_forward(x, params)
    jax.block_until_ready(out)

    assert out.shape == (B, 1, H, W), out.shape
    assert bool(jnp.all(jnp.isfinite(out)))
    # Sigmoid range (tiny slack for the EUP approximate reciprocal).
    assert bool(jnp.all((out >= -1e-3) & (out <= 1.0 + 1e-3)))

    ref = _reference_forward(x, params)
    max_err = float(jnp.max(jnp.abs(out - ref)))
    # bf16 patches / z / 1x1-conv (per the perf review) add ~1e-3-scale error
    # vs the f32 reference; 1e-2 still catches any real bug (O(0.1-1) errors).
    assert max_err < 1e-2, max_err
    print("KERNEL_OK")
</pallas_src>

<mosaic_0001>
module attributes {stable_mosaic.version = 11 : i64} {
  func.func @_conv_stats_kernel(%arg0: i32, %arg1: memref<256x288xbf16, #tpu.memory_space<vmem>>, %arg2: memref<288x128xbf16, #tpu.memory_space<vmem>>, %arg3: memref<256x128xbf16, #tpu.memory_space<vmem>>, %arg4: memref<8x128xf32, #tpu.memory_space<vmem>>) attributes {dimension_semantics = [#tpu.dimension_semantics<parallel>], iteration_bounds = array<i64: 2>, scalar_prefetch = 0 : i64, scratch_operands = 0 : i64, tpu.core_type = #tpu.core_type<tc>, window_params = [{transform_indices = @transform_0, window_bounds = array<i64: 256, 288>}, {pipeline_mode = #tpu.pipeline_mode<synchronous>, transform_indices = @transform_1, window_bounds = array<i64: 288, 128>}, {transform_indices = @transform_2, window_bounds = array<i64: 256, 128>}, {transform_indices = @transform_3, window_bounds = array<i64: 8, 128>}]} {
    %c0 = arith.constant 0 : index
    %c0_0 = arith.constant 0 : index
    %0 = vector.load %arg1[%c0, %c0_0] : memref<256x288xbf16, #tpu.memory_space<vmem>>, vector<256x288xbf16>
    %c0_1 = arith.constant 0 : index
    %c0_2 = arith.constant 0 : index
    %1 = vector.load %arg2[%c0_1, %c0_2] : memref<288x128xbf16, #tpu.memory_space<vmem>>, vector<288x128xbf16>
    %cst = arith.constant dense<0.000000e+00> : vector<256x128xf32>
    %2 = tpu.matmul %0, %1, %cst {dimension_numbers = #tpu.dot_dimension_numbers<[1], [0], [0], [1], [0, 0, 1, 1], [], []>} : vector<256x288xbf16>, vector<288x128xbf16>, vector<256x128xf32> -> vector<256x128xf32>
    %cst_3 = arith.constant dense<0.000000e+00> : vector<128xf32>
    %3 = vector.multi_reduction <add>, %2, %cst_3 [0] : vector<256x128xf32> to vector<128xf32>
    %4 = vector.shape_cast %3 : vector<128xf32> to vector<1x128xf32>
    %5 = arith.mulf %2, %2 : vector<256x128xf32>
    %cst_4 = arith.constant dense<0.000000e+00> : vector<128xf32>
    %6 = vector.multi_reduction <add>, %5, %cst_4 [0] : vector<256x128xf32> to vector<128xf32>
    %7 = vector.shape_cast %6 : vector<128xf32> to vector<1x128xf32>
    %cst_5 = arith.constant 0.000000e+00 : f32
    %8 = vector.broadcast %cst_5 : f32 to vector<6x128xf32>
    %9 = tpu.concatenate %4, %7, %8 in 0 : vector<1x128xf32>, vector<1x128xf32>, vector<6x128xf32> -> vector<8x128xf32>
    %c0_6 = arith.constant 0 : index
    %c0_7 = arith.constant 0 : index
    %10 = vector.load %arg4[%c0_6, %c0_7] : memref<8x128xf32, #tpu.memory_space<vmem>>, vector<8x128xf32>
    tpu.vector_store %arg4[%c0_6, %c0_7], %9 {strides = array<i32>} : memref<8x128xf32, #tpu.memory_space<vmem>>, vector<8x128xf32>,
    %11 = arith.truncf %2 : vector<256x128xf32> to vector<256x128xbf16>
    %c0_8 = arith.constant 0 : index
    %c0_9 = arith.constant 0 : index
    %12 = vector.load %arg3[%c0_8, %c0_9] : memref<256x128xbf16, #tpu.memory_space<vmem>>, vector<256x128xbf16>
    tpu.vector_store %arg3[%c0_8, %c0_9], %11 {strides = array<i32>} : memref<256x128xbf16, #tpu.memory_space<vmem>>, vector<256x128xbf16>,
    return
  }
  func.func @transform_0(%arg0: i32) -> (i32, i32) {
    %c0_i32 = arith.constant 0 : i32
    %c0_i32_0 = arith.constant 0 : i32
    return %arg0, %c0_i32 : i32, i32
  }
  func.func @transform_1(%arg0: i32) -> (i32, i32) {
    %c0_i32 = arith.constant 0 : i32
    %c0_i32_0 = arith.constant 0 : i32
    %c0_i32_1 = arith.constant 0 : i32
    return %c0_i32, %c0_i32_0 : i32, i32
  }
  func.func @transform_2(%arg0: i32) -> (i32, i32) {
    %c0_i32 = arith.constant 0 : i32
    %c0_i32_0 = arith.constant 0 : i32
    return %arg0, %c0_i32 : i32, i32
  }
  func.func @transform_3(%arg0: i32) -> (i32, i32) {
    %c0_i32 = arith.constant 0 : i32
    %c0_i32_0 = arith.constant 0 : i32
    return %arg0, %c0_i32 : i32, i32
  }
}

module attributes {stable_mosaic.version = 11 : i64} {
  func.func @_bn_act_kernel(%arg0: i32, %arg1: memref<256x128xbf16, #tpu.memory_space<vmem>>, %arg2: memref<1x128xf32, #tpu.memory_space<vmem>>, %arg3: memref<1x128xf32, #tpu.memory_space<vmem>>, %arg4: memref<8x128xbf16, #tpu.memory_space<vmem>>, %arg5: memref<1x256xf32, #tpu.memory_space<vmem>>) attributes {dimension_semantics = [#tpu.dimension_semantics<parallel>], iteration_bounds = array<i64: 2>, scalar_prefetch = 0 : i64, scratch_operands = 0 : i64, tpu.core_type = #tpu.core_type<tc>, window_params = [{transform_indices = @transform_0, window_bounds = array<i64: 256, 128>}, {pipeline_mode = #tpu.pipeline_mode<synchronous>, transform_indices = @transform_1, window_bounds = array<i64: 1, 128>}, {pipeline_mode = #tpu.pipeline_mode<synchronous>, transform_indices = @transform_2, window_bounds = array<i64: 1, 128>}, {pipeline_mode = #tpu.pipeline_mode<synchronous>, transform_indices = @transform_3, window_bounds = array<i64: 8, 128>}, {transform_indices = @transform_4, window_bounds = array<i64: 1, 256>}]} {
    %c0 = arith.constant 0 : index
    %c0_0 = arith.constant 0 : index
    %0 = vector.load %arg1[%c0, %c0_0] : memref<256x128xbf16, #tpu.memory_space<vmem>>, vector<256x128xbf16>
    %1 = arith.extf %0 : vector<256x128xbf16> to vector<256x128xf32>
    %c0_1 = arith.constant 0 : index
    %c0_2 = arith.constant 0 : index
    %2 = vector.load %arg2[%c0_1, %c0_2] : memref<1x128xf32, #tpu.memory_space<vmem>>, vector<1x128xf32>
    %3 = vector.broadcast %2 : vector<1x128xf32> to vector<256x128xf32>
    %4 = arith.mulf %1, %3 : vector<256x128xf32>
    %c0_3 = arith.constant 0 : index
    %c0_4 = arith.constant 0 : index
    %5 = vector.load %arg3[%c0_3, %c0_4] : memref<1x128xf32, #tpu.memory_space<vmem>>, vector<1x128xf32>
    %6 = vector.broadcast %5 : vector<1x128xf32> to vector<256x128xf32>
    %7 = arith.addf %4, %6 : vector<256x128xf32>
    %cst = arith.constant 0.000000e+00 : f32
    %8 = vector.broadcast %cst : f32 to vector<256x128xf32>
    %9 = arith.maximumf %7, %8 : vector<256x128xf32>
    %c0_5 = arith.constant 0 : index
    %c0_6 = arith.constant 0 : index
    %10 = vector.load %arg4[%c0_5, %c0_6] : memref<8x128xbf16, #tpu.memory_space<vmem>>, vector<8x128xbf16>
    %11 = arith.truncf %9 : vector<256x128xf32> to vector<256x128xbf16>
    %cst_7 = arith.constant dense<0.000000e+00> : vector<8x256xf32>
    %12 = tpu.matmul %10, %11, %cst_7 {dimension_numbers = #tpu.dot_dimension_numbers<[1], [1], [0], [0], [0, 0, 1, 0], [], []>} : vector<8x128xbf16>, vector<256x128xbf16>, vector<8x256xf32> -> vector<8x256xf32>
    %13 = vector.extract_strided_slice %12 {offsets = [0, 0], sizes = [1, 256], strides = [1, 1]} : vector<8x256xf32> to vector<1x256xf32>
    %cst_8 = arith.constant 0.000000e+00 : f32
    %14 = vector.broadcast %cst_8 : f32 to vector<1x256xf32>
    %15 = arith.subf %14, %13 : vector<1x256xf32>
    %16 = math.exp %15 : vector<1x256xf32>
    %cst_9 = arith.constant 1.000000e+00 : f32
    %17 = vector.broadcast %cst_9 : f32 to vector<1x256xf32>
    %18 = arith.addf %17, %16 : vector<1x256xf32>
    %19 = tpu.reciprocal %18 {approx = true} : vector<1x256xf32> -> vector<1x256xf32>
    %c0_10 = arith.constant 0 : index
    %c0_11 = arith.constant 0 : index
    %20 = vector.load %arg5[%c0_10, %c0_11] : memref<1x256xf32, #tpu.memory_space<vmem>>, vector<1x256xf32>
    tpu.vector_store %arg5[%c0_10, %c0_11], %19 {strides = array<i32>} : memref<1x256xf32, #tpu.memory_space<vmem>>, vector<1x256xf32>,
    return
  }
  func.func @transform_0(%arg0: i32) -> (i32, i32) {
    %c0_i32 = arith.constant 0 : i32
    %c0_i32_0 = arith.constant 0 : i32
    return %arg0, %c0_i32 : i32, i32
  }
  func.func @transform_1(%arg0: i32) -> (i32, i32) {
    %c0_i32 = arith.constant 0 : i32
    %c0_i32_0 = arith.constant 0 : i32
    %c0_i32_1 = arith.constant 0 : i32
    return %c0_i32, %c0_i32_0 : i32, i32
  }
  func.func @transform_2(%arg0: i32) -> (i32, i32) {
    %c0_i32 = arith.constant 0 : i32
    %c0_i32_0 = arith.constant 0 : i32
    %c0_i32_1 = arith.constant 0 : i32
    return %c0_i32, %c0_i32_0 : i32, i32
  }
  func.func @transform_3(%arg0: i32) -> (i32, i32) {
    %c0_i32 = arith.constant 0 : i32
    %c0_i32_0 = arith.constant 0 : i32
    %c0_i32_1 = arith.constant 0 : i32
    return %c0_i32, %c0_i32_0 : i32, i32
  }
  func.func @transform_4(%arg0: i32) -> (i32, i32) {
    %c0_i32 = arith.constant 0 : i32
    %c0_i32_0 = arith.constant 0 : i32
    return %c0_i32, %arg0 : i32, i32
  }
}

</mosaic_0001>

<bundles_post_ra>
// kernel: predictor_forward.2
= control target key start
LH: loop header
LB: loop body
LE: loop exit
PB: predicated region body
PF: predicated region fallthrough
CT: control target
= control target key end

     0   :  { %s1723_s12 = smov 0   ;;  %s2016_s0 = inlined_call_operand.vmem [shape: bf16[512,288], index: 0, kind: input, shape index: {}]   ;;  %s2017_s1 = inlined_call_operand.vmem [shape: bf16[288,128], index: 1, kind: input, shape index: {}]   ;;  %s2018_s2 = inlined_call_operand.vmem [shape: bf16[512,128], index: 2, kind: output, shape index: {0}]   ;;  %s2019_s3 = inlined_call_operand.vmem [shape: f32[16,128], index: 3, kind: output, shape index: {1}]  }
   0x1 LB: > { %s1729_s13 = sadd.s32 4294967295, %s1701_s12   ;;  %p1219_p0 = scmp.ge.s32.totalorder %s1701_s12, 1  ;;  %s1701_s12 = sphi %s1723_s12, %s14_s12  }
   0x2   : > { %p142_p1 = scmp.lt.s32.totalorder %s1701_s12, 3 }
   0x4   : > { %p143_p2 = pnand %p1219_p0, %p142_p1 }
   0x5   : > { %s1220_s20 = sshll.u32 (!%p143_p2), %s1729_s13, 5  ;;  %p184_p4 = scmp.lt.s32.totalorder (!%p143_p2), %s1729_s13, 1 }
   0x6   : > { %146 = sbr.rel (%p143_p2) target bundleno = 398 (0x18e), region = 28  ;;  %p172_p3 = scmp.lt.s32.totalorder (!%p143_p2), %s1220_s20, 63 }
   0xb   : > { %v1562_v0 = vld [vmem:[%s2017_s1 + $0x38] sm:$0xff]  ;;  %v1744_v2 = vld [vmem:[%s2017_s1 + $0x88] sm:$0xff]  ;;  %v1561_v3 = vld [vmem:[%s2017_s1 + $0x30] sm:$0xff]  ;;  %s2021_s20 = smov (!%p172_p3, %s1220_s20), 63  ;;  %vm637_vm0 = vcmask 261120   ;;  %s2023_s13 = smov (!%p184_p4, %s1729_s13), 1 }
   0xc   : > { %v1739_v1 = vld [vmem:[%s2017_s1 + $0x78] sm:$0xff]  ;;  %686 = vmatpush.bf16.msra.mxu0 %v1562_v0  ;;  %1668 = vmatpush.bf16.msra.mxu3 %v1562_v0  ;;  %v1569_v4 = vld [vmem:[%s2017_s1 + $0x70] sm:$0xff]  ;;  %v1758_v5 = vld [vmem:[%s2017_s1 + $0x80] sm:$0xff]  ;;  %s1686_s27 = smul.u32 12, %s2021_s20  ;;  %s1223_s4 = sshll.u32 %s2021_s20, 2  ;;  %vm1059_vm1 = vcmask 1040384  }
   0xd   : > { %775 = vmatpush.bf16.msra.mxu1 %v1739_v1  ;;  %870 = vmatpush.bf16.msra.mxu2 %v1744_v2  ;;  %v1560_v6 = vld [vmem:[%s2017_s1 + $0x28] sm:$0xff]  ;;  %v1559_v11 = vld [vmem:[%s2017_s1 + $0x20] sm:$0xff]  ;;  %v1558_v13 = vld [vmem:[%s2017_s1 + $0x18] sm:$0xff]  ;;  %s1905_s8 = scalar_lea.vmem %s2018_s2, %s1223_s4  ;;  %s1224_s20 = sshll.u32 %s2023_s13, 3  ;;  %vm1061_vm2 = vcmask 1041408  }
   0xe   : > { %v1568_v7 = vld [vmem:[%s2017_s1 + $0x68] sm:$0xff]  ;;  %s1773_s7 = scalar_lea.vmem %s2016_s0, %s1686_s27  ;;  %v1567_v12 = vld [vmem:[%s2017_s1 + $0x60] sm:$0xff]  ;;  %v1566_v14 = vld [vmem:[%s2017_s1 + $0x58] sm:$0xff]  ;;  %s187_s10 = scalar_lea.vmem %s2019_s3, %s1224_s20 }
   0xf   : > { %v1235_v8 = vld [vmem:[%s1773_s7 + $0x8] sm:$0xf]  ;;  %v1509_v9 = vld [vmem:[%s1773_s7 + $0x10] sm:$0xf0]  ;;  %v1247_v17 = vld [vmem:[%s1773_s7 + $0x20] sm:$0xf] }
  0x10   : > { %687 = vmatpush.bf16.msra.mxu0 %v1561_v3  ;;  %1669 = vmatpush.bf16.msra.mxu3 %v1561_v3  ;;  %v1236_v10 = vor.u32 %v1509_v9, %v1235_v8  ;;  %v1557_v15 = vld [vmem:[%s2017_s1 + $0x10] sm:$0xff]  ;;  %v1512_v18 = vld [vmem:[%s1773_s7 + $0x28] sm:$0xf0]  ;;  %v1555_v22 = vld [vmem:[%s2017_s1] sm:$0xff] }
  0x11   : > { %776 = vmatpush.bf16.msra.mxu1 %v1569_v4  ;;  %871 = vmatpush.bf16.msra.mxu2 %v1758_v5  ;;  %v1565_v16 = vld [vmem:[%s2017_s1 + $0x50] sm:$0xff]  ;;  %v1556_v19 = vld [vmem:[%s2017_s1 + $0x8] sm:$0xff]  ;;  %v1248_v21 = vor.u32 %v1512_v18, %v1247_v17  ;;  %v1227_v23 = vld [vmem:[%s1773_s7] sm:$0xf] }
  0x12   : > { %v1564_v20 = vld [vmem:[%s2017_s1 + $0x48] sm:$0xff]  ;;  %v1371_v25 = vld [vmem:[%s1773_s7 + $0x120] sm:$0xf]  ;;  %v1507_v28 = vld [vmem:[%s1773_s7 + $0x4] sm:$0xf] }
  0x13   : > { %v1508_v24 = vld [vmem:[%s1773_s7 + $0x8] sm:$0xf0]  ;;  %v1563_v27 = vld [vmem:[%s2017_s1 + $0x40] sm:$0xff]  ;;  %v1229_v29 = vld [vmem:[%s1773_s7 + $0xc] sm:$0xf0] }
  0x14   : > { %688 = vmatpush.bf16.msra.mxu0 %v1560_v6  ;;  %1670 = vmatpush.bf16.msra.mxu3 %v1560_v6  ;;  %v1544_v26 = vld [vmem:[%s1773_s7 + $0x128] sm:$0xf0]  ;;  %v1228_v30 = vor.u32 %v1508_v24, %v1227_v23  ;;  %v1232_v32 = vor.u32 %v1507_v28, %v1229_v29  ;;  %v1259_v33 = vld [vmem:[%s1773_s7 + $0x38] sm:$0xf]  ;;  %v1515_v34 = vld [vmem:[%s1773_s7 + $0x40] sm:$0xf0] }
  0x15   : > { %777 = vmatpush.bf16.msra.mxu1 %v1568_v7  ;;  %1489 = vmatmul.msk.bf16.vlgmr.msra.gmra.mxu2 %vm637_vm0, %v1236_v10  ;;  %v1372_v31 = vor.u32 %v1544_v26, %v1371_v25  ;;  %v1260_v35 = vor.u32 %v1515_v34, %v1259_v33  ;;  %v1239_v36 = vld [vmem:[%s1773_s7 + $0x18] sm:$0xf]  ;;  %v1511_v37 = vld [vmem:[%s1773_s7 + $0x20] sm:$0xf0]  ;;  %v1510_v40 = vld [vmem:[%s1773_s7 + $0x1c] sm:$0xf] }
  0x16   : > { %v1383_v38 = vld [vmem:[%s1773_s7 + $0x138] sm:$0xf]  ;;  %v1547_v39 = vld [vmem:[%s1773_s7 + $0x140] sm:$0xf0]  ;;  %v1241_v41 = vld [vmem:[%s1773_s7 + $0x24] sm:$0xf0]  ;;  %v1240_v42 = vor.u32 %v1511_v37, %v1239_v36 }
  0x17   : > { %v1384_v43 = vor.u32 %v1547_v39, %v1383_v38  ;;  %v1244_v44 = vor.u32 %v1510_v40, %v1241_v41  ;;  %v1271_v45 = vld [vmem:[%s1773_s7 + $0x50] sm:$0xf]  ;;  %v1518_v46 = vld [vmem:[%s1773_s7 + $0x58] sm:$0xf0]  ;;  %v1513_v52 = vld [vmem:[%s1773_s7 + $0x34] sm:$0xf] }
  0x18   : > { %689 = vmatpush.bf16.msra.mxu0 %v1559_v11  ;;  %1671 = vmatpush.bf16.msra.mxu3 %v1559_v11  ;;  %v1272_v47 = vor.u32 %v1518_v46, %v1271_v45  ;;  %v1251_v48 = vld [vmem:[%s1773_s7 + $0x30] sm:$0xf]  ;;  %v1514_v49 = vld [vmem:[%s1773_s7 + $0x38] sm:$0xf0]  ;;  %v1253_v53 = vld [vmem:[%s1773_s7 + $0x3c] sm:$0xf0] }
  0x19   : > { %778 = vmatpush.bf16.msra.mxu1 %v1567_v12  ;;  %v1395_v50 = vld [vmem:[%s1773_s7 + $0x150] sm:$0xf]  ;;  %v1550_v51 = vld [vmem:[%s1773_s7 + $0x158] sm:$0xf0]  ;;  %v1252_v54 = vor.u32 %v1514_v49, %v1251_v48  ;;  %v1256_v56 = vor.u32 %v1513_v52, %v1253_v53  ;;  %v1283_v57 = vld [vmem:[%s1773_s7 + $0x68] sm:$0xf] }
  0x1a   : > { %v1396_v55 = vor.u32 %v1550_v51, %v1395_v50  ;;  %v1521_v58 = vld [vmem:[%s1773_s7 + $0x70] sm:$0xf0]  ;;  %v1263_v60 = vld [vmem:[%s1773_s7 + $0x48] sm:$0xf]  ;;  %v1516_v0 = vld [vmem:[%s1773_s7 + $0x4c] sm:$0xf] }
  0x1b   : > { %v1284_v59 = vor.u32 %v1521_v58, %v1283_v57  ;;  %v1517_v61 = vld [vmem:[%s1773_s7 + $0x50] sm:$0xf0]  ;;  %v1407_v62 = vld [vmem:[%s1773_s7 + $0x168] sm:$0xf]  ;;  %v1524_v6 = vld [vmem:[%s1773_s7 + $0x88] sm:$0xf0] }
  0x1c   : > { %690 = vmatpush.bf16.msra.mxu0 %v1558_v13  ;;  %1672 = vmatpush.bf16.msra.mxu3 %v1558_v13  ;;  %v1553_v63 = vld [vmem:[%s1773_s7 + $0x170] sm:$0xf0]  ;;  %v1275_v8 = vld [vmem:[%s1773_s7 + $0x60] sm:$0xf]  ;;  %v1520_v9 = vld [vmem:[%s1773_s7 + $0x68] sm:$0xf0] }
  0x1d   : > { %779 = vmatpush.bf16.msra.mxu1 %v1566_v14  ;;  %v1408_v3 = vor.u32 %v1553_v63, %v1407_v62  ;;  %v1543_v10 = vld [vmem:[%s1773_s7 + $0x124] sm:$0xf]  ;;  %v1373_v11 = vld [vmem:[%s1773_s7 + $0x12c] sm:$0xf0]  ;;  %v1307_v17 = vld [vmem:[%s1773_s7 + $0x98] sm:$0xf] }
  0x1e   : > { %v1277_v13 = vld [vmem:[%s1773_s7 + $0x6c] sm:$0xf0]  ;;  %v1527_v18 = vld [vmem:[%s1773_s7 + $0xa0] sm:$0xf0]  ;;  %v1385_v23 = vld [vmem:[%s1773_s7 + $0x144] sm:$0xf0] }
  0x1f   : > { %v1522_v24 = vld [vmem:[%s1773_s7 + $0x7c] sm:$0xf]  ;;  %v1289_v25 = vld [vmem:[%s1773_s7 + $0x84] sm:$0xf0]  ;;  %v1319_v29 = vld [vmem:[%s1773_s7 + $0xb0] sm:$0xf] }
  0x20   : > { %691 = vmatpush.bf16.msra.mxu0 %v1557_v15  ;;  %1673 = vmatpush.bf16.msra.mxu3 %v1557_v15  ;;  %v1376_v15 = vor.u32 %v1543_v10, %v1373_v11  ;;  %v1292_v28 = vor.u32 %v1522_v24, %v1289_v25  ;;  %v1526_v33 = vld [vmem:[%s1773_s7 + $0x98] sm:$0xf0]  ;;  %v1549_v34 = vld [vmem:[%s1773_s7 + $0x154] sm:$0xf]  ;;  %v1301_v37 = vld [vmem:[%s1773_s7 + $0x9c] sm:$0xf0] }
  0x21   : > { %780 = vmatpush.bf16.msra.mxu1 %v1565_v16  ;;  %v1525_v36 = vld [vmem:[%s1773_s7 + $0x94] sm:$0xf]  ;;  %v1331_v41 = vld [vmem:[%s1773_s7 + $0xc8] sm:$0xf]  ;;  %v1552_v46 = vld [vmem:[%s1773_s7 + $0x16c] sm:$0xf] }
  0x22   : > { %v1304_v40 = vor.u32 %v1525_v36, %v1301_v37  ;;  %v1529_v45 = vld [vmem:[%s1773_s7 + $0xb0] sm:$0xf0]  ;;  %v1528_v48 = vld [vmem:[%s1773_s7 + $0xac] sm:$0xf]  ;;  %v1313_v49 = vld [vmem:[%s1773_s7 + $0xb4] sm:$0xf0] }
  0x23   : > { %v1316_v53 = vor.u32 %v1528_v48, %v1313_v49  ;;  %v1323_v58 = vld [vmem:[%s1773_s7 + $0xc0] sm:$0xf]  ;;  %v1531_v62 = vld [vmem:[%s1773_s7 + $0xc4] sm:$0xf]  ;;  %v1325_v63 = vld [vmem:[%s1773_s7 + $0xcc] sm:$0xf0] }
  0x24   : > { %692 = vmatpush.bf16.msra.mxu0 %v1556_v19  ;;  %1674 = vmatpush.bf16.msra.mxu3 %v1556_v19  ;;  %v1308_v19 = vor.u32 %v1527_v18, %v1307_v17  ;;  %v1535_v18 = vld [vmem:[%s1773_s7 + $0xe0] sm:$0xf0]  ;;  %v1347_v49 = vld [vmem:[%s1773_s7 + $0xf0] sm:$0xf] }
  0x25   : > { %781 = vmatpush.bf16.msra.mxu1 %v1564_v20  ;;  %1490 = vmatmul.msk.bf16.gmra.mxu2 %vm637_vm0, %v1248_v21  ;;  %v1523_v21 = vld [vmem:[%s1773_s7 + $0x80] sm:$0xf0] }
  0x28   : > { %693 = vmatpush.bf16.msra.mxu0 %v1555_v22  ;;  %1675 = vmatpush.bf16.msra.mxu3 %v1555_v22  ;;  %v1546_v22 = vld [vmem:[%s1773_s7 + $0x13c] sm:$0xf] }
  0x29   : > { %782 = vmatpush.bf16.msra.mxu1 %v1563_v27 }
  0x2b   : > { %694 = vmatmul.bf16.vlgmr.msra.gmra.mxu0 %v1228_v30  ;;  %754 = vmatmul.bf16.vlgmr.msra.gmra.mxu3 %v1372_v31  ;;  %v1530_v30 = vld [vmem:[%s1773_s7 + $0xb8] sm:$0xf0] }
  0x2c   : > { %1676 = vmatpush.bf16.msrb.mxu3 %v1739_v1  ;;  %783 = vmatmul.bf16.vlgmr.msra.gmra.mxu1 %v1232_v32  ;;  %v1265_v1 = vld [vmem:[%s1773_s7 + $0x54] sm:$0xf0]  ;;  %v1320_v31 = vor.u32 %v1530_v30, %v1319_v29  ;;  %v1299_v32 = vld [vmem:[%s1773_s7 + $0x90] sm:$0xf] }
  0x2d   : > { %v1300_v38 = vor.u32 %v1526_v33, %v1299_v32 }
  0x30   : > { %1677 = vmatpush.bf16.msrb.mxu3 %v1569_v4  ;;  %v1268_v4 = vor.u32 %v1516_v0, %v1265_v1 }
  0x34   : > { %1678 = vmatpush.bf16.msrb.mxu3 %v1568_v7 }
  0x35   : > { %1491 = vmatmul.msk.bf16.gmra.mxu2 %vm637_vm0, %v1260_v35  ;;  %v1397_v35 = vld [vmem:[%s1773_s7 + $0x15c] sm:$0xf0] }
  0x36   : > { %v1400_v39 = vor.u32 %v1549_v34, %v1397_v35 }
  0x38   : > { %1679 = vmatpush.bf16.msrb.mxu3 %v1567_v12  ;;  %v1519_v12 = vld [vmem:[%s1773_s7 + $0x64] sm:$0xf] }
  0x3b   : > { %699 = vmatmul.bf16.gmra.mxu0 %v1240_v42  ;;  %759 = vmatmul.bf16.gmra.mxu3 %v1384_v43  ;;  %v1533_v42 = vld [vmem:[%s1773_s7 + $0xd0] sm:$0xf0] }
  0x3c   : > { %1680 = vmatpush.bf16.msrb.mxu3 %v1566_v14  ;;  %788 = vmatmul.bf16.gmra.mxu1 %v1244_v44  ;;  %v1276_v14 = vor.u32 %v1520_v9, %v1275_v8  ;;  %v1332_v43 = vor.u32 %v1533_v42, %v1331_v41  ;;  %v1311_v44 = vld [vmem:[%s1773_s7 + $0xa8] sm:$0xf]  ;;  %v1355_v8 = vld [vmem:[%s1773_s7 + $0xf8] sm:$0xf]  ;;  %v1539_v9 = vld [vmem:[%s1773_s7 + $0x100] sm:$0xf0] }
  0x3d   : > { %v1312_v50 = vor.u32 %v1529_v45, %v1311_v44  ;;  %v1542_v41 = vld [vmem:[%s1773_s7 + $0x118] sm:$0xf0] }
  0x40   : > { %1681 = vmatpush.bf16.msrb.mxu3 %v1565_v16  ;;  %v1280_v16 = vor.u32 %v1519_v12, %v1277_v13  ;;  %v1356_v13 = vor.u32 %v1539_v9, %v1355_v8 }
  0x44   : > { %1682 = vmatpush.bf16.msrb.mxu3 %v1564_v20  ;;  %v1287_v20 = vld [vmem:[%s1773_s7 + $0x78] sm:$0xf] }
  0x45   : > { %1492 = vmatmul.msk.bf16.gmra.mxu2 %vm637_vm0, %v1272_v47  ;;  %v1288_v26 = vor.u32 %v1523_v21, %v1287_v20  ;;  %v1409_v47 = vld [vmem:[%s1773_s7 + $0x174] sm:$0xf0]  ;;  %v1554_v20 = vld [vmem:[%s1773_s7 + $0x178] sm:$0xf0] }
  0x46   : > { %v1412_v51 = vor.u32 %v1552_v46, %v1409_v47  ;;  %v1534_v21 = vld [vmem:[%s1773_s7 + $0xdc] sm:$0xf] }
  0x48   : > { %1683 = vmatpush.bf16.msrb.mxu3 %v1563_v27  ;;  %v1388_v27 = vor.u32 %v1546_v22, %v1385_v23  ;;  %v1337_v22 = vld [vmem:[%s1773_s7 + $0xe4] sm:$0xf0] }
  0x49   : > { %v1340_v33 = vor.u32 %v1534_v21, %v1337_v22 }
  0x4b   : > { %704 = vmatmul.bf16.gmra.mxu0 %v1252_v54  ;;  %764 = vmatmul.bf16.gmra.mxu3 %v1396_v55  ;;  %v1343_v54 = vld [vmem:[%s1773_s7 + $0xe0] sm:$0xf]  ;;  %v1536_v55 = vld [vmem:[%s1773_s7 + $0xe8] sm:$0xf0] }
  0x4c   : > { %1684 = vmatpush.bf16.msra.mxu3 %v1744_v2  ;;  %793 = vmatmul.bf16.gmra.mxu1 %v1256_v56  ;;  %v1264_v2 = vor.u32 %v1517_v61, %v1263_v60  ;;  %v1344_v57 = vor.u32 %v1536_v55, %v1343_v54  ;;  %v1403_v60 = vld [vmem:[%s1773_s7 + $0x158] sm:$0xf]  ;;  %v1551_v61 = vld [vmem:[%s1773_s7 + $0x160] sm:$0xf0] }
  0x4d   : > { %v1404_v1 = vor.u32 %v1551_v61, %v1403_v60 }
  0x50   : > { %1685 = vmatpush.bf16.msra.mxu3 %v1758_v5  ;;  %v1295_v5 = vld [vmem:[%s1773_s7 + $0x80] sm:$0xf] }
  0x51   : > { %v1296_v7 = vor.u32 %v1524_v6, %v1295_v5 }
  0x55   : > { %1493 = vmatmul.msk.bf16.gmra.mxu2 %vm637_vm0, %v1284_v59  ;;  %v1532_v59 = vld [vmem:[%s1773_s7 + $0xc8] sm:$0xf0] }
  0x56   : > { %v1324_v0 = vor.u32 %v1532_v59, %v1323_v58 }
  0x5b   : > { %709 = vmatmul.bf16.gmra.mxu0 %v1264_v2  ;;  %769 = vmatmul.bf16.gmra.mxu3 %v1408_v3 }
  0x5c   : > { %798 = vmatmul.bf16.gmra.mxu1 %v1268_v4  ;;  %v1328_v4 = vor.u32 %v1531_v62, %v1325_v63 }
  0x65   : > { %1494 = vmatmul.msk.bf16.gmra.mxu2 %vm637_vm0, %v1296_v7 }
  0x6b   : > { %714 = vmatmul.bf16.gmra.mxu0 %v1276_v14  ;;  %843 = vmatmul.bf16.vlgmr.msrb.gmra.mxu3 %v1376_v15 }
  0x6c   : > { %803 = vmatmul.bf16.gmra.mxu1 %v1280_v16  ;;  %v1335_v16 = vld [vmem:[%s1773_s7 + $0xd8] sm:$0xf] }
  0x75   : > { %1495 = vmatmul.msk.bf16.gmra.mxu2 %vm637_vm0, %v1308_v19  ;;  %v1415_v19 = vld [vmem:[%s1773_s7 + $0x170] sm:$0xf] }
  0x76   : > { %v1416_v29 = vor.u32 %v1554_v20, %v1415_v19 }
  0x7b   : > { %719 = vmatmul.bf16.gmra.mxu0 %v1288_v26  ;;  %848 = vmatmul.bf16.gmra.mxu3 %v1388_v27 }
  0x7c   : > { %808 = vmatmul.bf16.gmra.mxu1 %v1292_v28  ;;  %v1336_v28 = vor.u32 %v1535_v18, %v1335_v16  ;;  %v1540_v16 = vld [vmem:[%s1773_s7 + $0x10c] sm:$0xf] }
  0x85   : > { %1496 = vmatmul.msk.bf16.gmra.mxu2 %vm637_vm0, %v1320_v31 }
  0x8b   : > { %724 = vmatmul.bf16.gmra.mxu0 %v1300_v38  ;;  %853 = vmatmul.bf16.gmra.mxu3 %v1400_v39 }
  0x8c   : > { %813 = vmatmul.bf16.gmra.mxu1 %v1304_v40  ;;  %v1367_v40 = vld [vmem:[%s1773_s7 + $0x110] sm:$0xf] }
  0x8d   : > { %v1368_v46 = vor.u32 %v1542_v41, %v1367_v40 }
  0x95   : > { %1497 = vmatmul.msk.bf16.gmra.mxu2 %vm637_vm0, %v1332_v43 }
  0x98   : > { %v873_v52 = vpop.f32.mrf.mxu2 }
  0x9b   : > { %729 = vmatmul.bf16.gmra.mxu0 %v1312_v50  ;;  %858 = vmatmul.bf16.gmra.mxu3 %v1412_v51  ;;  %v1538_v50 = vld [vmem:[%s1773_s7 + $0xf8] sm:$0xf0]  ;;  %v1537_v51 = vld [vmem:[%s1773_s7 + $0xf4] sm:$0xf] }
  0x9c   : > { %818 = vmatmul.bf16.gmra.mxu1 %v1316_v53 }
  0xa0   : > { %v875_v56 = vpop.f32.mrf.mxu2 }
  0xa5   : > { %1498 = vmatmul.msk.bf16.gmra.mxu2 %vm637_vm0, %v1344_v57  ;;  %v1348_v57 = vor.u32 %v1538_v50, %v1347_v49 }
  0xa8   : > { %v878_v2 = vpop.f32.mrf.mxu2  ;;  %v695_v3 = vpop.f32.mrf.mxu0 }
  0xa9   : > { %v784_v5 = vpop.f32.mrf.mxu1 }
  0xaa   : > { %v785_v6 = vadd.f32 %v784_v5, %v695_v3  ;;  %v1545_v5 = vld [vmem:[%s1773_s7 + $0x130] sm:$0xf0] }
  0xab   : > { %734 = vmatmul.bf16.gmra.mxu0 %v1324_v0  ;;  %1503 = vmatmul.msk.bf16.vlgmr.msra.gmra.mxu3 %vm637_vm0, %v1404_v1 }
  0xac   : > { %823 = vmatmul.bf16.gmra.mxu1 %v1328_v4  ;;  %v874_v14 = vadd.f32 %v873_v52, %v785_v6  ;;  %v1349_v52 = vld [vmem:[%s1773_s7 + $0xfc] sm:$0xf0]  ;;  %v1379_v4 = vld [vmem:[%s1773_s7 + $0x128] sm:$0xf] }
  0xad   : > { %v1352_v61 = vor.u32 %v1537_v51, %v1349_v52 }
  0xae   : > { %v1893_v7 = vpop.f32.mrf.mxu3  ;;  %v990_v23 = vmul.f32 %v874_v14, %v874_v14 }
  0xb0   : > { %v880_v10 = vpop.f32.mrf.mxu2  ;;  %v697_v11 = vpop.f32.mrf.mxu0 }
  0xb1   : > { %v786_v12 = vpop.f32.mrf.mxu1 }
  0xb2   : > { %v787_v15 = vadd.f32 %v786_v12, %v697_v11  ;;  %v1380_v11 = vor.u32 %v1545_v5, %v1379_v4 }
  0xb4   : > { %v876_v17 = vadd.f32 %v875_v56, %v787_v15  ;;  %v1541_v15 = vld [vmem:[%s1773_s7 + $0x110] sm:$0xf0] }
  0xb5   : > { %1499 = vmatmul.msk.bf16.gmra.mxu2 %vm637_vm0, %v1356_v13 }
  0xb6   : > { %v953_v24 = vadd.f32 %v876_v17, %v874_v14  ;;  %v991_v25 = vmul.f32 %v876_v17, %v876_v17  ;;  %v1576_v26 = vpack.c.bf16 %v876_v17, %v874_v14  ;;  %v1910_v27 = vpop.f32.mrf.mxu3  ;;  %v1359_v14 = vld [vmem:[%s1773_s7 + $0x108] sm:$0xf]  ;;  %v1361_v17 = vld [vmem:[%s1773_s7 + $0x114] sm:$0xf0] }
  0xb7   : > { %v1360_v22 = vor.u32 %v1541_v15, %v1359_v14 }
  0xb8   : > { %v1022_v30 = vadd.f32 %v991_v25, %v990_v23  ;;  %1577 = vst [vmem:[%s1905_s8] sm:$0xff] %v1576_v26   ;;  %v883_v31 = vpop.f32.mrf.mxu2  ;;  %v700_v32 = vpop.f32.mrf.mxu0  ;;  %v1364_v26 = vor.u32 %v1540_v16, %v1361_v17 }
  0xb9   : > { %v789_v34 = vpop.f32.mrf.mxu1 }
  0xba   : > { %v790_v35 = vadd.f32 %v789_v34, %v700_v32  ;;  %v1391_v34 = vld [vmem:[%s1773_s7 + $0x140] sm:$0xf] }
  0xbb   : > { %739 = vmatmul.bf16.gmra.mxu0 %v1336_v28  ;;  %1504 = vmatmul.msk.bf16.gmra.mxu3 %vm637_vm0, %v1416_v29 }
  0xbc   : > { %v879_v36 = vadd.f32 %v878_v2, %v790_v35  ;;  %828 = vmatmul.bf16.gmra.mxu1 %v1340_v33  ;;  %v1548_v35 = vld [vmem:[%s1773_s7 + $0x148] sm:$0xf0] }
  0xbd   : > { %v1392_v41 = vor.u32 %v1548_v35, %v1391_v34 }
  0xbe   : > { %v954_v37 = vadd.f32 %v953_v24, %v879_v36  ;;  %v992_v38 = vmul.f32 %v879_v36, %v879_v36  ;;  %v1914_v39 = vpop.f32.mrf.mxu3 }
  0xc0   : > { %v1023_v42 = vadd.f32 %v1022_v30, %v992_v38  ;;  %v885_v43 = vpop.f32.mrf.mxu2  ;;  %v702_v44 = vpop.f32.mrf.mxu0 }
  0xc1   : > { %v791_v45 = vpop.f32.mrf.mxu1 }
  0xc2   : > { %v792_v47 = vadd.f32 %v791_v45, %v702_v44 }
  0xc4   : > { %v881_v48 = vadd.f32 %v880_v10, %v792_v47 }
  0xc5   : > { %1500 = vmatmul.msk.bf16.gmra.mxu2 %vm637_vm0, %v1368_v46 }
  0xc6   : > { %v955_v53 = vadd.f32 %v954_v37, %v881_v48  ;;  %v993_v54 = vmul.f32 %v881_v48, %v881_v48  ;;  %v1581_v55 = vpack.c.bf16 %v881_v48, %v879_v36  ;;  %v1923_v56 = vpop.f32.mrf.mxu3 }
  0xc8   : > { %v1024_v58 = vadd.f32 %v1023_v42, %v993_v54  ;;  %1653 = vst [vmem:[%s1905_s8 + $0x8] sm:$0xff] %v1581_v55   ;;  %v888_v59 = vpop.f32.mrf.mxu2  ;;  %v705_v60 = vpop.f32.mrf.mxu0 }
  0xc9   : > { %v794_v62 = vpop.f32.mrf.mxu1 }
  0xca   : > { %v795_v63 = vadd.f32 %v794_v62, %v705_v60 }
  0xcb   : > { %744 = vmatmul.bf16.gmra.mxu0 %v1348_v57 }
  0xcc   : > { %v884_v0 = vadd.f32 %v883_v31, %v795_v63  ;;  %833 = vmatmul.bf16.gmra.mxu1 %v1352_v61 }
  0xce   : > { %v956_v1 = vadd.f32 %v955_v53, %v884_v0  ;;  %v994_v2 = vmul.f32 %v884_v0, %v884_v0  ;;  %v1926_v3 = vpop.f32.mrf.mxu3 }
  0xd0   : > { %v1025_v6 = vadd.f32 %v1024_v58, %v994_v2  ;;  %v890_v8 = vpop.f32.mrf.mxu2  ;;  %v707_v9 = vpop.f32.mrf.mxu0 }
  0xd1   : > { %v796_v10 = vpop.f32.mrf.mxu1 }
  0xd2   : > { %v797_v12 = vadd.f32 %v796_v10, %v707_v9 }
  0xd4   : > { %v886_v13 = vadd.f32 %v885_v43, %v797_v12 }
  0xd5   : > { %1501 = vmatmul.msk.bf16.gmra.mxu2 %vm637_vm0, %v1380_v11 }
  0xd6   : > { %v957_v18 = vadd.f32 %v956_v1, %v886_v13  ;;  %v995_v19 = vmul.f32 %v886_v13, %v886_v13  ;;  %v1586_v20 = vpack.c.bf16 %v886_v13, %v884_v0  ;;  %v1935_v21 = vpop.f32.mrf.mxu3 }
  0xd8   : > { %v1026_v23 = vadd.f32 %v1025_v6, %v995_v19  ;;  %1654 = vst [vmem:[%s1905_s8 + $0x10] sm:$0xff] %v1586_v20   ;;  %v893_v24 = vpop.f32.mrf.mxu2  ;;  %v710_v25 = vpop.f32.mrf.mxu0 }
  0xd9   : > { %v799_v28 = vpop.f32.mrf.mxu1 }
  0xda   : > { %v800_v29 = vadd.f32 %v799_v28, %v710_v25 }
  0xdb   : > { %749 = vmatmul.bf16.gmra.mxu0 %v1360_v22 }
  0xdc   : > { %v889_v30 = vadd.f32 %v888_v59, %v800_v29  ;;  %838 = vmatmul.bf16.gmra.mxu1 %v1364_v26 }
  0xde   : > { %v958_v31 = vadd.f32 %v957_v18, %v889_v30  ;;  %v996_v32 = vmul.f32 %v889_v30, %v889_v30  ;;  %v1938_v33 = vpop.f32.mrf.mxu3 }
  0xe0   : > { %v1027_v36 = vadd.f32 %v1026_v23, %v996_v32  ;;  %v895_v37 = vpop.f32.mrf.mxu2  ;;  %v712_v38 = vpop.f32.mrf.mxu0 }
  0xe1   : > { %v801_v40 = vpop.f32.mrf.mxu1 }
  0xe2   : > { %v802_v42 = vadd.f32 %v801_v40, %v712_v38 }
  0xe4   : > { %v891_v43 = vadd.f32 %v890_v8, %v802_v42 }
  0xe5   : > { %1502 = vmatmul.msk.bf16.gmra.mxu2 %vm637_vm0, %v1392_v41 }
  0xe6   : > { %v959_v44 = vadd.f32 %v958_v31, %v891_v43  ;;  %v997_v45 = vmul.f32 %v891_v43, %v891_v43  ;;  %v1591_v46 = vpack.c.bf16 %v891_v43, %v889_v30  ;;  %v1943_v47 = vpop.f32.mrf.mxu3 }
  0xe8   : > { %v1028_v48 = vadd.f32 %v1027_v36, %v997_v45  ;;  %1655 = vst [vmem:[%s1905_s8 + $0x18] sm:$0xff] %v1591_v46   ;;  %v898_v49 = vpop.f32.mrf.mxu2  ;;  %v715_v50 = vpop.f32.mrf.mxu0 }
  0xe9   : > { %v804_v51 = vpop.f32.mrf.mxu1 }
  0xea   : > { %v805_v52 = vadd.f32 %v804_v51, %v715_v50 }
  0xec   : > { %v894_v53 = vadd.f32 %v893_v24, %v805_v52 }
  0xee   : > { %v960_v54 = vadd.f32 %v959_v44, %v894_v53  ;;  %v998_v55 = vmul.f32 %v894_v53, %v894_v53  ;;  %v844_v57 = vpop.f32.mrf.mxu3 }
  0xef   : > { %v1947_v58 = vadd.f32 %v844_v57, %v1893_v7 }
  0xf0   : > { %v1029_v59 = vadd.f32 %v1028_v48, %v998_v55  ;;  %v900_v60 = vpop.f32.mrf.mxu2  ;;  %v717_v61 = vpop.f32.mrf.mxu0 }
  0xf1   : > { %v806_v62 = vpop.f32.mrf.mxu1 }
  0xf2   : > { %v807_v63 = vadd.f32 %v806_v62, %v717_v61 }
  0xf4   : > { %v896_v0 = vadd.f32 %v895_v37, %v807_v63 }
  0xf6   : > { %v961_v1 = vadd.f32 %v960_v54, %v896_v0  ;;  %v999_v2 = vmul.f32 %v896_v0, %v896_v0  ;;  %v1596_v4 = vpack.c.bf16 %v896_v0, %v894_v53  ;;  %v846_v5 = vpop.f32.mrf.mxu3 }
  0xf7   : > { %v1950_v6 = vadd.f32 %v846_v5, %v1910_v27 }
  0xf8   : > { %v1030_v8 = vadd.f32 %v1029_v59, %v999_v2  ;;  %1656 = vst [vmem:[%s1905_s8 + $0x20] sm:$0xff] %v1596_v4   ;;  %v903_v9 = vpop.f32.mrf.mxu2  ;;  %v720_v10 = vpop.f32.mrf.mxu0 }
  0xf9   : > { %v809_v11 = vpop.f32.mrf.mxu1 }
  0xfa   : > { %v810_v7 = vadd.f32 %v809_v11, %v720_v10 }
  0xfc   : > { %v899_v12 = vadd.f32 %v898_v49, %v810_v7 }
  0xfe   : > { %v962_v13 = vadd.f32 %v961_v1, %v899_v12  ;;  %v1000_v14 = vmul.f32 %v899_v12, %v899_v12  ;;  %v849_v15 = vpop.f32.mrf.mxu3 }
  0xff   : > { %v1954_v16 = vadd.f32 %v849_v15, %v1914_v39 }
 0x100   : > { %v1031_v17 = vadd.f32 %v1030_v8, %v1000_v14  ;;  %v905_v18 = vpop.f32.mrf.mxu2  ;;  %v722_v19 = vpop.f32.mrf.mxu0 }
 0x101   : > { %v811_v20 = vpop.f32.mrf.mxu1 }
 0x102   : > { %v812_v27 = vadd.f32 %v811_v20, %v722_v19 }
 0x104   : > { %v901_v22 = vadd.f32 %v900_v60, %v812_v27 }
 0x106   : > { %v963_v23 = vadd.f32 %v962_v13, %v901_v22  ;;  %v1001_v24 = vmul.f32 %v901_v22, %v901_v22  ;;  %v1601_v25 = vpack.c.bf16 %v901_v22, %v899_v12  ;;  %v851_v26 = vpop.f32.mrf.mxu3 }
 0x107   : > { %v1957_v28 = vadd.f32 %v851_v26, %v1923_v56 }
 0x108   : > { %v1032_v29 = vadd.f32 %v1031_v17, %v1001_v24  ;;  %1657 = vst [vmem:[%s1905_s8 + $0x28] sm:$0xff] %v1601_v25   ;;  %v908_v30 = vpop.f32.mrf.mxu2  ;;  %v725_v31 = vpop.f32.mrf.mxu0 }
 0x109   : > { %v814_v32 = vpop.f32.mrf.mxu1 }
 0x10a   : > { %v815_v39 = vadd.f32 %v814_v32, %v725_v31 }
 0x10c   : > { %v904_v34 = vadd.f32 %v903_v9, %v815_v39 }
 0x10e   : > { %v964_v35 = vadd.f32 %v963_v23, %v904_v34  ;;  %v1002_v36 = vmul.f32 %v904_v34, %v904_v34  ;;  %v854_v37 = vpop.f32.mrf.mxu3 }
 0x10f   : > { %v855_v14 = vadd.f32 %v854_v37, %v1926_v3 }
 0x110   : > { %v1033_v38 = vadd.f32 %v1032_v29, %v1002_v36  ;;  %v910_v40 = vpop.f32.mrf.mxu2  ;;  %v727_v41 = vpop.f32.mrf.mxu0 }
 0x111   : > { %v816_v42 = vpop.f32.mrf.mxu1 }
 0x112   : > { %v817_v43 = vadd.f32 %v816_v42, %v727_v41 }
 0x114   : > { %v906_v44 = vadd.f32 %v905_v18, %v817_v43 }
 0x116   : > { %v1960_v45 = vadd.f32 %v964_v35, %v906_v44  ;;  %v1003_v56 = vmul.f32 %v906_v44, %v906_v44  ;;  %v1606_v46 = vpack.c.bf16 %v906_v44, %v904_v34  ;;  %v856_v48 = vpop.f32.mrf.mxu3 }
 0x117   : > { %v857_v15 = vadd.f32 %v856_v48, %v1935_v21 }
 0x118   : > { %v1962_v49 = vadd.f32 %v1033_v38, %v1003_v56  ;;  %1658 = vst [vmem:[%s1905_s8 + $0x30] sm:$0xff] %v1606_v46   ;;  %v913_v50 = vpop.f32.mrf.mxu2  ;;  %v730_v51 = vpop.f32.mrf.mxu0 }
 0x119   : > { %v819_v52 = vpop.f32.mrf.mxu1 }
 0x11a   : > { %v820_v54 = vadd.f32 %v819_v52, %v730_v51 }
 0x11c   : > { %v909_v61 = vadd.f32 %v908_v30, %v820_v54 }
 0x11e   : > { %v859_v53 = vpop.f32.mrf.mxu3 }
 0x11f   : > { %v860_v39 = vadd.f32 %v859_v53, %v1938_v33 }
 0x120   : > { %v915_v55 = vpop.f32.mrf.mxu2  ;;  %v732_v57 = vpop.f32.mrf.mxu0 }
 0x121   : > { %v821_v59 = vpop.f32.mrf.mxu1 }
 0x122   : > { %v822_v60 = vadd.f32 %v821_v59, %v732_v57 }
 0x124   : > { %v911_v62 = vadd.f32 %v910_v40, %v822_v60 }
 0x126   : > { %v1611_v63 = vpack.c.bf16 %v911_v62, %v909_v61  ;;  %v861_v0 = vpop.f32.mrf.mxu3  ;;  %v1005_v51 = vmul.f32 %v911_v62, %v911_v62 }
 0x127   : > { %v862_v34 = vadd.f32 %v861_v0, %v1943_v47  ;;  %v1004_v47 = vmul.f32 %v909_v61, %v909_v61 }
 0x128   : > { %1659 = vst [vmem:[%s1905_s8 + $0x38] sm:$0xff] %v1611_v63   ;;  %v918_v1 = vpop.f32.mrf.mxu2  ;;  %v735_v2 = vpop.f32.mrf.mxu0 }
 0x129   : > { %v824_v4 = vpop.f32.mrf.mxu1  ;;  %v1035_v54 = vadd.f32 %v1962_v49, %v1004_v47 }
 0x12a   : > { %v825_v8 = vadd.f32 %v824_v4, %v735_v2 }
 0x12b   : > { %v1036_v60 = vadd.f32 %v1035_v54, %v1005_v51 }
 0x12c   : > { %v914_v12 = vadd.f32 %v913_v50, %v825_v8  ;;  %v966_v50 = vadd.f32 %v1960_v45, %v909_v61 }
 0x12e   : > { %v943_v5 = vpop.f32.mrf.mxu3  ;;  %v1006_v57 = vmul.f32 %v914_v12, %v914_v12 }
 0x12f   : > { %v1968_v19 = vadd.f32 %v943_v5, %v855_v14 }
 0x130   : > { %v920_v9 = vpop.f32.mrf.mxu2  ;;  %v737_v10 = vpop.f32.mrf.mxu0  ;;  %v1037_v5 = vadd.f32 %v1036_v60, %v1006_v57 }
 0x131   : > { %v826_v11 = vpop.f32.mrf.mxu1  ;;  %v1018_v54 = vmul.f32 %v1968_v19, %v1968_v19 }
 0x132   : > { %v827_v7 = vadd.f32 %v826_v11, %v737_v10 }
 0x134   : > { %v916_v13 = vadd.f32 %v915_v55, %v827_v7  ;;  %v967_v55 = vadd.f32 %v966_v50, %v911_v62 }
 0x136   : > { %v1616_v17 = vpack.c.bf16 %v916_v13, %v914_v12  ;;  %v945_v18 = vpop.f32.mrf.mxu3  ;;  %v968_v63 = vadd.f32 %v967_v55, %v914_v12  ;;  %v1007_v0 = vmul.f32 %v916_v13, %v916_v13 }
 0x137   : > { %v1970_v20 = vadd.f32 %v945_v18, %v857_v15 }
 0x138   : > { %1660 = vst [vmem:[%s1905_s8 + $0x40] sm:$0xff] %v1616_v17   ;;  %v923_v27 = vpop.f32.mrf.mxu2  ;;  %v740_v22 = vpop.f32.mrf.mxu0  ;;  %v969_v8 = vadd.f32 %v968_v63, %v916_v13  ;;  %v1038_v45 = vadd.f32 %v1037_v5, %v1007_v0 }
 0x139   : > { %v1646_v23 = vpack.c.bf16 %v1970_v20, %v1968_v19  ;;  %v829_v24 = vpop.f32.mrf.mxu1  ;;  %v1019_v57 = vmul.f32 %v1970_v20, %v1970_v20 }
 0x13a   : > { %v830_v26 = vadd.f32 %v829_v24, %v740_v22 }
 0x13b   : > { %1666 = vst [vmem:[%s1905_s8 + $0x70] sm:$0xff] %v1646_v23  }
 0x13c   : > { %v919_v31 = vadd.f32 %v918_v1, %v830_v26 }
 0x13e   : > { %v948_v25 = vpop.f32.mrf.mxu3  ;;  %v970_v61 = vadd.f32 %v969_v8, %v919_v31 }
 0x13f   : > { %v1978_v37 = vadd.f32 %v948_v25, %v860_v39 }
 0x140   : > { %v925_v3 = vpop.f32.mrf.mxu2  ;;  %v742_v29 = vpop.f32.mrf.mxu0 }
 0x141   : > { %v831_v21 = vpop.f32.mrf.mxu1 }
 0x142   : > { %v832_v30 = vadd.f32 %v831_v21, %v742_v29 }
 0x144   : > { %v921_v32 = vadd.f32 %v920_v9, %v832_v30  ;;  %v1008_v9 = vmul.f32 %v919_v31, %v919_v31 }
 0x146   : > { %v1621_v35 = vpack.c.bf16 %v921_v32, %v919_v31  ;;  %v950_v36 = vpop.f32.mrf.mxu3  ;;  %v1009_v11 = vmul.f32 %v921_v32, %v921_v32  ;;  %v1039_v7 = vadd.f32 %v1038_v45, %v1008_v9  ;;  %v971_v14 = vadd.f32 %v970_v61, %v921_v32 }
 0x147   : > { %v1980_v38 = vadd.f32 %v950_v36, %v862_v34 }
 0x148   : > { %1661 = vst [vmem:[%s1905_s8 + $0x48] sm:$0xff] %v1621_v35   ;;  %v928_v40 = vpop.f32.mrf.mxu2  ;;  %v745_v41 = vpop.f32.mrf.mxu0  ;;  %v1040_v15 = vadd.f32 %v1039_v7, %v1009_v11 }
 0x149   : > { %v1651_v42 = vpack.c.bf16 %v1980_v38, %v1978_v37  ;;  %v834_v43 = vpop.f32.mrf.mxu1 }
 0x14a   : > { %v835_v44 = vadd.f32 %v834_v43, %v745_v41 }
 0x14b   : > { %1667 = vst [vmem:[%s1905_s8 + $0x78] sm:$0xff] %v1651_v42  }
 0x14c   : > { %v924_v52 = vadd.f32 %v923_v27, %v835_v44 }
 0x14e   : > { %v1010_v49 = vmul.f32 %v924_v52, %v924_v52  ;;  %v972_v17 = vadd.f32 %v971_v14, %v924_v52 }
 0x150   : > { %v930_v56 = vpop.f32.mrf.mxu2  ;;  %v747_v33 = vpop.f32.mrf.mxu0  ;;  %v1041_v24 = vadd.f32 %v1040_v15, %v1010_v49 }
 0x151   : > { %v836_v46 = vpop.f32.mrf.mxu1 }
 0x152   : > { %v837_v48 = vadd.f32 %v836_v46, %v747_v33 }
 0x154   : > { %v926_v53 = vadd.f32 %v925_v3, %v837_v48 }
 0x156   : > { %v1626_v59 = vpack.c.bf16 %v926_v53, %v924_v52  ;;  %v1011_v12 = vmul.f32 %v926_v53, %v926_v53  ;;  %v973_v25 = vadd.f32 %v972_v17, %v926_v53 }
 0x158   : > { %1662 = vst [vmem:[%s1905_s8 + $0x50] sm:$0xff] %v1626_v59   ;;  %v933_v1 = vpop.f32.mrf.mxu2  ;;  %v750_v2 = vpop.f32.mrf.mxu0  ;;  %v1042_v21 = vadd.f32 %v1041_v24, %v1011_v12 }
 0x159   : > { %v839_v4 = vpop.f32.mrf.mxu1  ;;  %v934_v22 = vadd.f32 %v933_v1, %v1947_v58  ;;  %v1021_v1 = vmul.f32 %v1980_v38, %v1980_v38 }
 0x15a   : > { %v840_v10 = vadd.f32 %v839_v4, %v750_v2 }
 0x15b   : > { %v1014_v36 = vmul.f32 %v934_v22, %v934_v22 }
 0x15c   : > { %v929_v62 = vadd.f32 %v928_v40, %v840_v10 }
 0x15e   : > { %v1012_v26 = vmul.f32 %v929_v62, %v929_v62  ;;  %v974_v30 = vadd.f32 %v973_v25, %v929_v62 }
 0x160   : > { %v935_v18 = vpop.f32.mrf.mxu2  ;;  %v752_v27 = vpop.f32.mrf.mxu0  ;;  %v1043_v32 = vadd.f32 %v1042_v21, %v1012_v26 }
 0x161   : > { %v936_v23 = vadd.f32 %v935_v18, %v1950_v6  ;;  %v841_v13 = vpop.f32.mrf.mxu1 }
 0x162   : > { %v842_v3 = vadd.f32 %v841_v13, %v752_v27 }
 0x163   : > { %v1636_v29 = vpack.c.bf16 %v936_v23, %v934_v22  ;;  %v1015_v42 = vmul.f32 %v936_v23, %v936_v23 }
 0x164   : > { %v931_v31 = vadd.f32 %v930_v56, %v842_v3 }
 0x165   : > { %1664 = vst [vmem:[%s1905_s8 + $0x60] sm:$0xff] %v1636_v29  }
 0x166   : > { %v975_v39 = vadd.f32 %v974_v30, %v931_v31  ;;  %v1013_v34 = vmul.f32 %v931_v31, %v931_v31  ;;  %v1631_v35 = vpack.c.bf16 %v931_v31, %v929_v62 }
 0x168   : > { %v1044_v40 = vadd.f32 %v1043_v32, %v1013_v34  ;;  %1663 = vst [vmem:[%s1905_s8 + $0x58] sm:$0xff] %v1631_v35   ;;  %v938_v58 = vpop.f32.mrf.mxu2  ;;  %v976_v6 = vadd.f32 %v975_v39, %v934_v22 }
 0x169   : > { %v939_v41 = vadd.f32 %v938_v58, %v1954_v16 }
 0x16a   : > { %v977_v43 = vadd.f32 %v976_v6, %v936_v23  ;;  %v1045_v44 = vadd.f32 %v1044_v40, %v1014_v36 }
 0x16b   : > { %v1016_v33 = vmul.f32 %v939_v41, %v939_v41 }
 0x16c   : > { %v978_v46 = vadd.f32 %v977_v43, %v939_v41  ;;  %v1046_v47 = vadd.f32 %v1045_v44, %v1015_v42 }
 0x16e   : > { %v1047_v56 = vadd.f32 %v1046_v47, %v1016_v33 }
 0x170   : > { %v940_v48 = vpop.f32.mrf.mxu2 }
 0x171   : > { %v941_v50 = vadd.f32 %v940_v48, %v1957_v28  ;;  %v1020_v28 = vmul.f32 %v1978_v37, %v1978_v37 }
 0x173   : > { %v979_v51 = vadd.f32 %v978_v46, %v941_v50  ;;  %v1017_v52 = vmul.f32 %v941_v50, %v941_v50  ;;  %v1641_v53 = vpack.c.bf16 %v941_v50, %v939_v41 }
 0x175   : > { %v980_v16 = vadd.f32 %v979_v51, %v1968_v19  ;;  %v1048_v55 = vadd.f32 %v1047_v56, %v1017_v52  ;;  %1665 = vst [vmem:[%s1905_s8 + $0x68] sm:$0xff] %v1641_v53  }
 0x177   : > { %v981_v59 = vadd.f32 %v980_v16, %v1970_v20  ;;  %v1049_v60 = vadd.f32 %v1048_v55, %v1018_v54 }
 0x179   : > { %v982_v63 = vadd.f32 %v981_v59, %v1978_v37  ;;  %v1050_v0 = vadd.f32 %v1049_v60, %v1019_v57 }
 0x17b   : > { %v983_v19 = vadd.f32 %v982_v63, %v1980_v38  ;;  %v1051_v2 = vadd.f32 %v1050_v0, %v1020_v28 }
 0x17d   : > { %v984_v4 = vrot.slane %v983_v19, 4  ;;  %v1052_v5 = vadd.f32 %v1051_v2, %v1021_v1 }
 0x17f   : > { %v985_v8 = vadd.f32 %v984_v4, %v983_v19  ;;  %v1053_v9 = vrot.slane %v1052_v5, 4 }
 0x181   : > { %v986_v10 = vrot.slane %v985_v8, 2  ;;  %v1054_v20 = vadd.f32 %v1053_v9, %v1052_v5 }
 0x183   : > { %v987_v45 = vadd.f32 %v986_v10, %v985_v8  ;;  %v1055_v61 = vrot.slane %v1054_v20, 2 }
 0x185   : > { %v988_v11 = vrot.slane %v987_v45, 1  ;;  %v1056_v7 = vadd.f32 %v1055_v61, %v1054_v20 }
 0x187   : > { %v1057_v37 = vrot.slane %v1056_v7, 1  ;;  %v989_v14 = vadd.f32 %v988_v11, %v987_v45 }
 0x189   : > { %v1058_v49 = vadd.f32 %v1057_v37, %v1056_v7 }
 0x18b   : > { %v1060_v38 = vsel %vm1059_vm1, %v989_v14, %v1058_v49 }
 0x18c   : > { %v1062_v62 = vsel %vm1061_vm2, %v1060_v38, 0.0 }
 0x18d   : > { %1063 = vst [vmem:[%s187_s10] sm:$0xff] %v1062_v62 }
 0x18e PF: > { %s14_s12 = sadd.s32 1, %s1701_s12  }
 0x18f   : > { %p11_p5 = scmp.ge.s32.totalorder %s14_s12, 4  }
 0x191   :  { %13 = sbr.rel (!%p11_p5) target bundleno = 1 (0x1), region = 70 }

// kernel: squeeze.7
= control target key start
LH: loop header
LB: loop body
LE: loop exit
PB: predicated region body
PF: predicated region fallthrough
CT: control target
= control target key end

     0   :  { %s130_s0 = inlined_call_operand.vmem [shape: f32[512], index: 0, kind: input, shape index: {}]   ;;  %s131_s1 = inlined_call_operand.hbm [shape: f32[2,1,16,16], index: 1, kind: output, shape index: {}]  }
   0x1   :  { %v5_v0 = vld [vmem:[%s130_s0] sm:$0xf] }
   0x2   :  { %6 = vst [vmem:[#allocation2] sm:$0xf] %v5_v0 }
   0x3   :  { %2 = vsyncpa [#allocation1], 0  ;;  %s98_s0 = smov 112   ;;  %s99_s8 = smov 80   ;;  %vm8_vm0 = vcmask 130048  }
   0x4   :  { %s100_s9 = smov 48   ;;  %s101_s10 = smov 96  }
   0x5   :  { %s102_s11 = smov 64   ;;  %s103_s12 = smov 32  }
   0x6   :  { %s104_s13 = smov 16   ;;  %s105_s14 = smov [#allocation0]  }
   0x7   :  { %s55_s15 = sshll.u32 %s105_s14, 4  ;;  %s57_s1 = sshll.u32 %s131_s1, 4  ;;  %s56_s15 = int_to_ptr.vmem [resolvable:$true] %s55_s15  ;;  %s58_s1 = int_to_ptr.hbm [resolvable:$true] %s57_s1 }
   0x9   :  { %v10_v1 = vld [vmem:[#allocation2] sm:$0xf]  }
   0xa   :  { %v22_v2 = vld [vmem:[#allocation2] sm:$0xf]   ;;  %11 = vrot.lane.b32.xlu0 %v10_v1, %s98_s0 }
   0xb   :  { %23 = vrot.lane.b32.xlu1 %v22_v2, %s99_s8  ;;  %v34_v3 = vld [vmem:[#allocation2] sm:$0xf]  }
   0xc   :  { %35 = vrot.lane.b32.xlu2 %v34_v3, %s100_s9  ;;  %v16_v4 = vld [vmem:[#allocation2] sm:$0xf]  }
   0xd   :  { %v28_v5 = vld [vmem:[#allocation2] sm:$0xf]  }
   0xe   :  { %v40_v6 = vld [vmem:[#allocation2] sm:$0xf]  }
   0xf   :  { %v46_v7 = vld [vmem:[#allocation2] sm:$0xf]  }
  0x10   :  { %v7_v9 = vld [vmem:[#allocation2] sm:$0xf]  }
  0x11   :  { %9 = vst.msk [vmem:[#allocation0] ss:$8 sm:$0xf] %vm8_vm0, %v7_v9  }
  0x12   :  { %17 = vrot.lane.b32.xlu0 %v16_v4, %s101_s10 }
  0x13   :  { %29 = vrot.lane.b32.xlu1 %v28_v5, %s102_s11 }
  0x14   :  { %41 = vrot.lane.b32.xlu2 %v40_v6, %s103_s12 }
  0x1a   :  { %47 = vrot.lane.b32.xlu0 %v46_v7, %s104_s13 }
  0x66   :  { %v36_v8 = vpop.permute.xlu2 %35  }
  0x67   :  { %39 = vst.msk [vmem:[#allocation0 + $0x5] ss:$8 sm:$0xf] %vm8_vm0, %v36_v8  }
  0x6e   :  { %v42_v10 = vpop.permute.xlu2 %41  }
  0x6f   :  { %45 = vst.msk [vmem:[#allocation0 + $0x6] ss:$8 sm:$0xf] %vm8_vm0, %v42_v10  }
  0x7c   :  { %v12_v11 = vpop.permute.xlu0 %11  }
  0x7d   :  { %v24_v12 = vpop.permute.xlu1 %23   ;;  %15 = vst.msk [vmem:[#allocation0 + $0x1] ss:$8 sm:$0xf] %vm8_vm0, %v12_v11  }
  0x7e   :  { %27 = vst.msk [vmem:[#allocation0 + $0x3] ss:$8 sm:$0xf] %vm8_vm0, %v24_v12  }
  0x84   :  { %v18_v13 = vpop.permute.xlu0 %17  }
  0x85   :  { %v30_v14 = vpop.permute.xlu1 %29   ;;  %21 = vst.msk [vmem:[#allocation0 + $0x2] ss:$8 sm:$0xf] %vm8_vm0, %v18_v13  }
  0x86   :  { %33 = vst.msk [vmem:[#allocation0 + $0x4] ss:$8 sm:$0xf] %vm8_vm0, %v30_v14  }
  0x8c   :  { %v48_v15 = vpop.permute.xlu0 %47  }
  0x8d   :  { %51 = vst.msk [vmem:[#allocation0 + $0x7] ss:$8 sm:$0xf] %vm8_vm0, %v48_v15  }
  0x8e   :  { %60 = dma.vmem_to_hbm [thread:$0]  %s56_s15, 512, %s58_s1, [#allocation1]  }
  0x8f   :  { %96 = dma.done.wait [#allocation1], 512  }
  0x90   :  { %97 = vsyncadd [#allocation1], 4294966784 }
  0x91   :  { %63 = vsyncpa [#allocation1], 1 }

// kernel: predictor_forward.3
= control target key start
LH: loop header
LB: loop body
LE: loop exit
PB: predicated region body
PF: predicated region fallthrough
CT: control target
= control target key end

     0   :  { %s621_s15 = smov 0   ;;  %s737_s0 = inlined_call_operand.vmem [shape: bf16[512,128], index: 0, kind: input, shape index: {}]   ;;  %s738_s1 = inlined_call_operand.vmem [shape: f32[1,128], index: 1, kind: input, shape index: {}]   ;;  %s739_s2 = inlined_call_operand.vmem [shape: f32[1,128], index: 2, kind: input, shape index: {}]   ;;  %s740_s3 = inlined_call_operand.vmem [shape: bf16[8,128], index: 3, kind: input, shape index: {}]   ;;  %s741_s4 = inlined_call_operand.vmem [shape: f32[1,512], index: 4, kind: output, shape index: {}]  }
   0x1 LB: > { %s481_s16 = sadd.s32 4294967295, %s594_s15   ;;  %p485_p0 = scmp.ge.s32.totalorder %s594_s15, 1  ;;  %s594_s15 = sphi %s621_s15, %s14_s15  }
   0x2   : > { %p163_p1 = scmp.lt.s32.totalorder %s594_s15, 3 }
   0x4   : > { %p164_p2 = pnand %p485_p0, %p163_p1 }
   0x5   : > { %s486_s17 = sshll.u32 (!%p164_p2), %s481_s16, 5  ;;  %s488_s28 = sshll.u32 (!%p164_p2), %s481_s16, 1 }
   0x6   : > { %167 = sbr.rel (%p164_p2) target bundleno = 239 (0xef), region = 36  ;;  %p189_p3 = scmp.lt.s32.totalorder (!%p164_p2), %s486_s17, 63 }
   0x7   : > { %p195_p4 = scmp.lt.s32.totalorder (!%p164_p2), %s488_s28, 3 }
   0xb   : > { %s743_s17 = smov (!%p189_p3, %s486_s17), 63  ;;  %v639_v0 = vld [vmem:[%s738_s1] ss:$0 sm:$0xff]  ;;  %s745_s28 = smov (!%p195_p4, %s488_s28), 3  ;;  %vm423_vm0 = vcmask 1040384  }
   0xc   : > { %s487_s18 = sshll.u32 %s743_s17, 2  ;;  %v647_v6 = vld [vmem:[%s739_s2] ss:$0 sm:$0xff]  ;;  %s197_s5 = scalar_lea.vmem %s741_s4, %s745_s28 }
   0xd   : > { %s634_s21 = scalar_lea.vmem %s737_s0, %s487_s18 }
   0xe   : > { %v561_v1 = vld [vmem:[%s634_s21 + $0x38] sm:$0xff]   ;;  %v560_v3 = vld [vmem:[%s634_s21 + $0x30] sm:$0xff]   ;;  %v559_v30 = vld [vmem:[%s634_s21 + $0x28] sm:$0xff]  }
   0xf   : > { %v569_v2 = vld [vmem:[%s634_s21 + $0x78] sm:$0xff]   ;;  %v521_v4 = vunpack.c.l.bf16 %v561_v1  ;;  %v522_v5 = vunpack.c.h.bf16 %v561_v1  ;;  %v568_v9 = vld [vmem:[%s634_s21 + $0x70] sm:$0xff]   ;;  %v517_v10 = vunpack.c.l.bf16 %v560_v3  ;;  %v518_v11 = vunpack.c.h.bf16 %v560_v3  ;;  %v567_v35 = vld [vmem:[%s634_s21 + $0x68] sm:$0xff]  }
  0x10   : > { %v553_v7 = vunpack.c.l.bf16 %v569_v2  ;;  %v554_v8 = vunpack.c.h.bf16 %v569_v2  ;;  %v549_v12 = vunpack.c.l.bf16 %v568_v9  ;;  %v550_v13 = vunpack.c.h.bf16 %v568_v9  ;;  %v558_v46 = vld [vmem:[%s634_s21 + $0x20] sm:$0xff]   ;;  %v565_v9 = vld [vmem:[%s634_s21 + $0x58] sm:$0xff]  }
  0x11   : > { %v281_v14 = vmul.f32 %v639_v0, %v521_v4  ;;  %v282_v15 = vmul.f32 %v639_v0, %v522_v5  ;;  %v279_v18 = vmul.f32 %v639_v0, %v517_v10  ;;  %v280_v19 = vmul.f32 %v639_v0, %v518_v11  ;;  %v566_v49 = vld [vmem:[%s634_s21 + $0x60] sm:$0xff]  }
  0x12   : > { %v297_v16 = vmul.f32 %v639_v0, %v553_v7  ;;  %v298_v17 = vmul.f32 %v639_v0, %v554_v8  ;;  %v295_v20 = vmul.f32 %v639_v0, %v549_v12  ;;  %v296_v21 = vmul.f32 %v639_v0, %v550_v13  ;;  %v557_v8 = vld [vmem:[%s634_s21 + $0x18] sm:$0xff]  }
  0x13   : > { %v317_v22 = vadd.f32 %v647_v6, %v281_v14  ;;  %v318_v23 = vadd.f32 %v647_v6, %v282_v15  ;;  %v315_v26 = vadd.f32 %v647_v6, %v279_v18  ;;  %v316_v27 = vadd.f32 %v647_v6, %v280_v19 }
  0x14   : > { %v333_v24 = vadd.f32 %v647_v6, %v297_v16  ;;  %v334_v25 = vadd.f32 %v647_v6, %v298_v17  ;;  %v331_v28 = vadd.f32 %v647_v6, %v295_v20  ;;  %v332_v29 = vadd.f32 %v647_v6, %v296_v21 }
  0x15   : > { %v349_v31 = vmax.f32 %v317_v22, 0.0  ;;  %v350_v32 = vmax.f32 %v318_v23, 0.0  ;;  %v347_v36 = vmax.f32 %v315_v26, 0.0  ;;  %v348_v37 = vmax.f32 %v316_v27, 0.0 }
  0x16   : > { %v365_v33 = vmax.f32 %v333_v24, 0.0  ;;  %v366_v34 = vmax.f32 %v334_v25, 0.0  ;;  %v513_v40 = vunpack.c.l.bf16 %v559_v30  ;;  %v514_v41 = vunpack.c.h.bf16 %v559_v30  ;;  %v556_v24 = vld [vmem:[%s634_s21 + $0x10] sm:$0xff]  }
  0x17   : > { %v375_v38 = vpack.c.bf16 %v350_v32, %v349_v31  ;;  %v363_v42 = vmax.f32 %v331_v28, 0.0  ;;  %v364_v43 = vmax.f32 %v332_v29, 0.0  ;;  %v545_v44 = vunpack.c.l.bf16 %v567_v35  ;;  %v564_v29 = vld [vmem:[%s634_s21 + $0x50] sm:$0xff]  }
  0x18   : > { %v383_v39 = vpack.c.bf16 %v366_v34, %v365_v33  ;;  %v546_v45 = vunpack.c.h.bf16 %v567_v35  ;;  %v277_v47 = vmul.f32 %v639_v0, %v513_v40  ;;  %v278_v48 = vmul.f32 %v639_v0, %v514_v41 }
  0x19   : > { %384 = vmatpush.bf16.xpose.msra.mxu0 %v375_v38  ;;  %v293_v50 = vmul.f32 %v639_v0, %v545_v44  ;;  %v509_v52 = vunpack.c.l.bf16 %v558_v46  ;;  %v510_v53 = vunpack.c.h.bf16 %v558_v46  ;;  %v374_v54 = vpack.c.bf16 %v348_v37, %v347_v36  ;;  %v555_v46 = vld [vmem:[%s634_s21 + $0x8] sm:$0xff]  }
  0x1a   : > { %397 = vmatpush.bf16.xpose.msra.mxu1 %v383_v39  ;;  %v294_v51 = vmul.f32 %v639_v0, %v546_v45  ;;  %v382_v55 = vpack.c.bf16 %v364_v43, %v363_v42  ;;  %v541_v56 = vunpack.c.l.bf16 %v566_v49  ;;  %v542_v57 = vunpack.c.h.bf16 %v566_v49  ;;  %v563_v49 = vld [vmem:[%s634_s21 + $0x48] sm:$0xff]  }
  0x1b   : > { %v313_v58 = vadd.f32 %v647_v6, %v277_v47  ;;  %v314_v59 = vadd.f32 %v647_v6, %v278_v48  ;;  %v329_v60 = vadd.f32 %v647_v6, %v293_v50  ;;  %v275_v62 = vmul.f32 %v639_v0, %v509_v52 }
  0x1c   : > { %v330_v61 = vadd.f32 %v647_v6, %v294_v51  ;;  %v276_v63 = vmul.f32 %v639_v0, %v510_v53  ;;  %v291_v1 = vmul.f32 %v639_v0, %v541_v56  ;;  %v292_v2 = vmul.f32 %v639_v0, %v542_v57 }
  0x1d   : > { %v345_v3 = vmax.f32 %v313_v58, 0.0  ;;  %v346_v4 = vmax.f32 %v314_v59, 0.0  ;;  %v361_v5 = vmax.f32 %v329_v60, 0.0  ;;  %v311_v10 = vadd.f32 %v647_v6, %v275_v62 }
  0x1e   : > { %v362_v7 = vmax.f32 %v330_v61, 0.0  ;;  %v312_v11 = vadd.f32 %v647_v6, %v276_v63  ;;  %v327_v12 = vadd.f32 %v647_v6, %v291_v1  ;;  %v328_v13 = vadd.f32 %v647_v6, %v292_v2 }
  0x1f   : > { %v505_v14 = vunpack.c.l.bf16 %v557_v8  ;;  %v506_v15 = vunpack.c.h.bf16 %v557_v8  ;;  %v373_v16 = vpack.c.bf16 %v346_v4, %v345_v3  ;;  %v537_v18 = vunpack.c.l.bf16 %v565_v9 }
  0x20   : > { %v381_v17 = vpack.c.bf16 %v362_v7, %v361_v5  ;;  %v538_v19 = vunpack.c.h.bf16 %v565_v9  ;;  %v343_v20 = vmax.f32 %v311_v10, 0.0  ;;  %v344_v21 = vmax.f32 %v312_v11, 0.0  ;;  %v492_v5 = vld [vmem:[%s634_s21] sm:$0xff]  }
  0x21   : > { %385 = vmatpush.bf16.xpose.msra.mxu0 %v374_v54  ;;  %v273_v22 = vmul.f32 %v639_v0, %v505_v14  ;;  %v274_v23 = vmul.f32 %v639_v0, %v506_v15  ;;  %v359_v25 = vmax.f32 %v327_v12, 0.0  ;;  %v360_v26 = vmax.f32 %v328_v13, 0.0  ;;  %v562_v7 = vld [vmem:[%s634_s21 + $0x40] sm:$0xff]  }
  0x22   : > { %398 = vmatpush.bf16.xpose.msra.mxu1 %v382_v55  ;;  %v289_v27 = vmul.f32 %v639_v0, %v537_v18  ;;  %v290_v28 = vmul.f32 %v639_v0, %v538_v19  ;;  %v501_v30 = vunpack.c.l.bf16 %v556_v24  ;;  %v502_v31 = vunpack.c.h.bf16 %v556_v24 }
  0x23   : > { %v309_v32 = vadd.f32 %v647_v6, %v273_v22  ;;  %v310_v33 = vadd.f32 %v647_v6, %v274_v23  ;;  %v533_v34 = vunpack.c.l.bf16 %v564_v29  ;;  %v534_v35 = vunpack.c.h.bf16 %v564_v29 }
  0x24   : > { %v372_v36 = vpack.c.bf16 %v344_v21, %v343_v20  ;;  %v380_v37 = vpack.c.bf16 %v360_v26, %v359_v25  ;;  %v325_v38 = vadd.f32 %v647_v6, %v289_v27  ;;  %v326_v39 = vadd.f32 %v647_v6, %v290_v28 }
  0x25   : > { %v271_v40 = vmul.f32 %v639_v0, %v501_v30  ;;  %v272_v41 = vmul.f32 %v639_v0, %v502_v31  ;;  %v341_v42 = vmax.f32 %v309_v32, 0.0  ;;  %v342_v43 = vmax.f32 %v310_v33, 0.0 }
  0x26   : > { %v287_v44 = vmul.f32 %v639_v0, %v533_v34  ;;  %v288_v45 = vmul.f32 %v639_v0, %v534_v35  ;;  %v357_v47 = vmax.f32 %v325_v38, 0.0  ;;  %v358_v48 = vmax.f32 %v326_v39, 0.0 }
  0x27   : > { %v307_v50 = vadd.f32 %v647_v6, %v271_v40  ;;  %v308_v51 = vadd.f32 %v647_v6, %v272_v41  ;;  %v497_v52 = vunpack.c.l.bf16 %v555_v46  ;;  %v371_v53 = vpack.c.bf16 %v342_v43, %v341_v42 }
  0x28   : > { %v323_v54 = vadd.f32 %v647_v6, %v287_v44  ;;  %v324_v55 = vadd.f32 %v647_v6, %v288_v45  ;;  %v379_v56 = vpack.c.bf16 %v358_v48, %v357_v47  ;;  %v498_v57 = vunpack.c.h.bf16 %v555_v46 }
  0x29   : > { %386 = vmatpush.bf16.xpose.msra.mxu0 %v373_v16  ;;  %v529_v58 = vunpack.c.l.bf16 %v563_v49  ;;  %v530_v59 = vunpack.c.h.bf16 %v563_v49  ;;  %v339_v60 = vmax.f32 %v307_v50, 0.0  ;;  %v340_v61 = vmax.f32 %v308_v51, 0.0 }
  0x2a   : > { %399 = vmatpush.bf16.xpose.msra.mxu1 %v381_v17  ;;  %v269_v62 = vmul.f32 %v639_v0, %v497_v52  ;;  %v355_v63 = vmax.f32 %v323_v54, 0.0  ;;  %v356_v1 = vmax.f32 %v324_v55, 0.0  ;;  %v270_v2 = vmul.f32 %v639_v0, %v498_v57 }
  0x2b   : > { %v285_v3 = vmul.f32 %v639_v0, %v529_v58  ;;  %v286_v4 = vmul.f32 %v639_v0, %v530_v59  ;;  %v370_v8 = vpack.c.bf16 %v340_v61, %v339_v60  ;;  %v493_v11 = vunpack.c.l.bf16 %v492_v5 }
  0x2c   : > { %v305_v9 = vadd.f32 %v647_v6, %v269_v62  ;;  %v378_v10 = vpack.c.bf16 %v356_v1, %v355_v63  ;;  %v494_v12 = vunpack.c.h.bf16 %v492_v5  ;;  %v525_v13 = vunpack.c.l.bf16 %v562_v7 }
  0x2d   : > { %v306_v14 = vadd.f32 %v647_v6, %v270_v2  ;;  %v321_v15 = vadd.f32 %v647_v6, %v285_v3  ;;  %v322_v16 = vadd.f32 %v647_v6, %v286_v4  ;;  %v526_v17 = vunpack.c.h.bf16 %v562_v7 }
  0x2e   : > { %v337_v18 = vmax.f32 %v305_v9, 0.0  ;;  %v267_v19 = vmul.f32 %v639_v0, %v493_v11  ;;  %v268_v20 = vmul.f32 %v639_v0, %v494_v12  ;;  %v283_v21 = vmul.f32 %v639_v0, %v525_v13 }
  0x2f   : > { %v338_v22 = vmax.f32 %v306_v14, 0.0  ;;  %v353_v23 = vmax.f32 %v321_v15, 0.0  ;;  %v354_v24 = vmax.f32 %v322_v16, 0.0  ;;  %v284_v25 = vmul.f32 %v639_v0, %v526_v17  ;;  %v367_v0 = vld [vmem:[%s740_s3] sm:$0xf] }
  0x30   : > { %v303_v26 = vadd.f32 %v647_v6, %v267_v19  ;;  %v304_v27 = vadd.f32 %v647_v6, %v268_v20  ;;  %v319_v30 = vadd.f32 %v647_v6, %v283_v21  ;;  %v426_v49 = vlaneseq }
  0x31   : > { %387 = vmatpush.bf16.xpose.msra.mxu0 %v372_v36  ;;  %v369_v28 = vpack.c.bf16 %v338_v22, %v337_v18  ;;  %v377_v29 = vpack.c.bf16 %v354_v24, %v353_v23  ;;  %v320_v31 = vadd.f32 %v647_v6, %v284_v25 }
  0x32   : > { %400 = vmatpush.bf16.xpose.msra.mxu1 %v380_v37  ;;  %v335_v32 = vmax.f32 %v303_v26, 0.0  ;;  %v336_v33 = vmax.f32 %v304_v27, 0.0  ;;  %v351_v34 = vmax.f32 %v319_v30, 0.0  ;;  %vm428_vm1 = vcmp.lt.s32.totalorder %v426_v49, 256 }
  0x33   : > { %v352_v35 = vmax.f32 %v320_v31, 0.0 }
  0x34   : > { %v368_v36 = vpack.c.bf16 %v336_v33, %v335_v32 }
  0x35   : > { %v376_v37 = vpack.c.bf16 %v352_v35, %v351_v34 }
  0x39   : > { %388 = vmatpush.bf16.xpose.msra.mxu0 %v371_v53 }
  0x3a   : > { %401 = vmatpush.bf16.xpose.msra.mxu1 %v379_v56 }
  0x41   : > { %389 = vmatpush.bf16.xpose.msra.mxu0 %v370_v8 }
  0x42   : > { %402 = vmatpush.bf16.xpose.msra.mxu1 %v378_v10 }
  0x49   : > { %390 = vmatpush.bf16.xpose.msra.mxu0 %v369_v28 }
  0x4a   : > { %403 = vmatpush.bf16.xpose.msra.mxu1 %v377_v29 }
  0x51   : > { %391 = vmatpush.bf16.xpose.msra.mxu0 %v368_v36 }
  0x52   : > { %404 = vmatpush.bf16.xpose.msra.mxu1 %v376_v37 }
  0x58   : > { %392 = vmatmul.bf16.vlgmr.msra.gmra.mxu0 %v367_v0 }
  0x59   : > { %405 = vmatmul.bf16.vlgmr.msra.gmra.mxu1 %v367_v0 }
  0xd5   : > { %v393_v38 = vpop.f32.mrf.mxu0 }
  0xd6   : > { %v406_v39 = vpop.f32.mrf.mxu1  ;;  %v410_v6 = vsub.f32 0.0, %v393_v38 }
  0xd7   : > { %v411_v40 = vsub.f32 0.0, %v406_v39 }
  0xd8   : > { %v412_v41 = vmul.f32 1.442695, %v410_v6 }
  0xd9   : > { %v414_v42 = vmul.f32 1.442695, %v411_v40 }
  0xda   : > { %580 = vpow2.f32 %v412_v41 }
  0xdb   : > { %582 = vpow2.f32 %v414_v42 }
  0xdd   : > { %v395_v43 = vpop.f32.mrf.mxu0 }
  0xde   : > { %v408_v44 = vpop.f32.mrf.mxu1 }
  0xe0   : > { %v581_v45 = vpop.eup %580 }
  0xe1   : > { %v583_v46 = vpop.eup %582  ;;  %v416_v47 = vadd.f32 1.0, %v581_v45 }
  0xe2   : > { %v417_v48 = vadd.f32 1.0, %v583_v46 }
  0xe3   : > { %584 = vrcp.f32 %v416_v47 }
  0xe4   : > { %586 = vrcp.f32 %v417_v48 }
  0xe9   : > { %v585_v50 = vpop.eup %584 }
  0xea   : > { %v587_v51 = vpop.eup %586 }
  0xeb   : > { %v422_v52 = vrot.slane %v587_v51, 7 }
  0xed   : > { %v424_v53 = vsel %vm423_vm0, %v585_v50, %v422_v52 }
  0xee   : > { %430 = vst.msk [vmem:[%s197_s5] sm:$0x3] %vm428_vm1, %v424_v53 }
  0xef PF: > { %s14_s15 = sadd.s32 1, %s594_s15  }
  0xf0   : > { %p11_p5 = scmp.ge.s32.totalorder %s14_s15, 4  }
  0xf2   :  { %13 = sbr.rel (!%p11_p5) target bundleno = 1 (0x1), region = 66 }

</bundles_post_ra>
